<compile_context>
chip_gen: v5e
topology: v5e:2x2
jax: 0.10.0
libtpu: 0.0.40
codegen_flags: <defaults>
</compile_context>

<pallas_src>
import functools

import jax
import jax.numpy as jnp
from jax.experimental import pallas as pl
from jax.experimental.pallas import tpu as pltpu

POOL_SIZE = 3          # pool_size in the PyTorch module
LN_EPS = 1e-5          # PyTorch nn.LayerNorm default eps

# MXU operand dtype: bf16 on real TPU (fp32 accumulate), f32 otherwise
# (interpret-mode / CPU backends reject BF16 x BF16 = F32 dots).
_ON_TPU = jax.default_backend() == "tpu"
MXU_DTYPE = jnp.bfloat16 if _ON_TPU else jnp.float32


def _layer_norm(x, g, b):
    mu = jnp.mean(x, axis=-1, keepdims=True)
    var = jnp.mean(jnp.square(x - mu), axis=-1, keepdims=True)
    return (x - mu) * jax.lax.rsqrt(var + LN_EPS) * g + b


# --------------------------------------------------------------------------
# Fused kernel: projections + pooling + LN + QKV + MHA + proj + residual.
# Per grid step it processes one batch element.
# --------------------------------------------------------------------------
def _fused_kernel(num_heads, num_feats, pool_area, *refs):
    text_ref = refs[0]
    x_refs = refs[1:1 + num_feats]                       # [1, WP_l*P, C_l]
    w_refs = refs[1 + num_feats:1 + 2 * num_feats]       # [C_l, E]
    b_refs = refs[1 + 2 * num_feats:1 + 3 * num_feats]   # [1, E]
    (qg_ref, qb_ref, qw_ref, qbias_ref,
     kg_ref, kb_ref, kw_ref, kbias_ref,
     vg_ref, vb_ref, vw_ref, vbias_ref,
     pw_ref, pbias_ref, o_ref) = refs[1 + 3 * num_feats:]

    mxu = MXU_DTYPE
    f32 = jnp.float32

    # ---- 1x1 conv projection + adaptive max pool (uniform windows) --------
    # Input rows are pixel-major / window-minor: row = pixel_offset*P + window,
    # so the per-window max is a maximum-tree over static [P, E] sublane slabs.
    pooled = []
    for l in range(num_feats):
        x = x_refs[l][0]                                 # [WP*P, C] fp32
        w = w_refs[l][...].astype(mxu)
        y = jnp.dot(x.astype(mxu), w,
                    preferred_element_type=f32) + b_refs[l][...]   # [WP*P, E]
        n_pix = y.shape[0] // pool_area                  # pixels per window
        m = y[0:pool_area, :]                            # [P, E]
        for j in range(1, n_pix):                        # static, small loop
            m = jnp.maximum(m, y[j * pool_area:(j + 1) * pool_area, :])
        pooled.append(m)
    img = jnp.concatenate(pooled, axis=0)                # [K, E], K = nf * P

    # ---- LayerNorm + Q/K/V linears (MXU dtype operands, fp32 accumulate) --
    t = text_ref[0]                                      # [Nt, Ct] fp32
    e = qw_ref.shape[1]
    hc = e // num_heads

    q = jnp.dot(_layer_norm(t, qg_ref[...], qb_ref[...]).astype(mxu),
                qw_ref[...].astype(mxu),
                preferred_element_type=f32) + qbias_ref[...]        # [Nt, E]
    k = jnp.dot(_layer_norm(img, kg_ref[...], kb_ref[...]).astype(mxu),
                kw_ref[...].astype(mxu),
                preferred_element_type=f32) + kbias_ref[...]        # [K, E]
    v = jnp.dot(_layer_norm(img, vg_ref[...], vb_ref[...]).astype(mxu),
                vw_ref[...].astype(mxu),
                preferred_element_type=f32) + vbias_ref[...]        # [K, E]

    q = q * (hc ** -0.5)                                 # fold scale once

    # ---- multi-head attention, output projection folded per head ----------
    pw = pw_ref[...]                                     # [E, Ct] fp32
    out = t + pbias_ref[...]                             # residual + proj bias
    for h in range(num_heads):                           # static head loop
        lo, hi = h * hc, (h + 1) * hc
        qh = q[:, lo:hi].astype(mxu)                     # [Nt, hc]
        kh = k[:, lo:hi].astype(mxu)                     # [K,  hc]
        vh = v[:, lo:hi].astype(mxu)                     # [K,  hc]
        logits = jax.lax.dot_general(
            qh, kh, (((1,), (1,)), ((), ())),
            preferred_element_type=f32)                  # [Nt, K]
        logits = logits - jnp.max(logits, axis=-1, keepdims=True)
        p = jnp.exp(logits)                              # fp32 softmax
        p = p * pl.reciprocal(jnp.sum(p, axis=-1, keepdims=True), approx=True)
        ctx = jnp.dot(p.astype(mxu), vh,
                      preferred_element_type=f32)        # [Nt, hc]
        out = out + jnp.dot(ctx.astype(mxu), pw[lo:hi, :].astype(mxu),
                            preferred_element_type=f32)  # [Nt, Ct]

    # with_scale=False -> scale == 1.0 (already included: out = proj(x) + text)
    o_ref[0] = out.astype(o_ref.dtype)


# --------------------------------------------------------------------------
# Wrapper: layout plumbing (NCHW -> pixel-major windows) + one pallas_call.
# --------------------------------------------------------------------------
def _window_flat(x_nchw, pool_size):
    """NCHW -> [B, WP*P, C] with row = pixel_in_window * P + window_index."""
    B, C, H, W = x_nchw.shape
    # TODO(synk): only uniform-window adaptive pooling (H, W divisible by 3).
    assert H % pool_size == 0 and W % pool_size == 0
    hwin, wwin = H // pool_size, W // pool_size
    return (x_nchw.transpose(0, 2, 3, 1)                          # B,H,W,C
            .reshape(B, pool_size, hwin, pool_size, wwin, C)
            .transpose(0, 2, 4, 1, 3, 5)                          # B,oh,ow,i,j,C
            .reshape(B, hwin * wwin * pool_size * pool_size, C))


def image_pooling_attention(text, image_features, params, num_heads,
                            pool_size=POOL_SIZE):
    B, Nt, Ct = text.shape
    E = params["q_w"].shape[1]
    assert E % num_heads == 0
    num_feats = len(image_features)
    P = pool_size * pool_size

    xws = [_window_flat(x, pool_size) for x in image_features]
    conv_ws = [w for (w, _) in params["proj_convs"]]
    conv_bs = [b.reshape(1, E) for (_, b) in params["proj_convs"]]

    r2 = lambda a: a.reshape(1, -1)
    args = ([text] + xws + conv_ws + conv_bs + [
        r2(params["q_ln_g"]), r2(params["q_ln_b"]), params["q_w"], r2(params["q_b"]),
        r2(params["k_ln_g"]), r2(params["k_ln_b"]), params["k_w"], r2(params["k_b"]),
        r2(params["v_ln_g"]), r2(params["v_ln_b"]), params["v_w"], r2(params["v_b"]),
        params["proj_w"], r2(params["proj_b"])])

    def batch_spec(a):
        nrest = a.ndim - 1
        return pl.BlockSpec((1,) + a.shape[1:],
                            lambda b, _n=nrest: (b,) + (0,) * _n)

    def const_spec(a):
        nd = a.ndim
        return pl.BlockSpec(a.shape, lambda b, _n=nd: (0,) * _n)

    in_specs = ([batch_spec(text)] + [batch_spec(x) for x in xws]
                + [const_spec(a) for a in args[1 + num_feats:]])

    kernel = functools.partial(_fused_kernel, num_heads, num_feats, P)
    return pl.pallas_call(
        kernel,
        out_shape=jax.ShapeDtypeStruct((B, Nt, Ct), jnp.float32),
        grid=(B,),
        in_specs=in_specs,
        out_specs=pl.BlockSpec((1, Nt, Ct), lambda b: (b, 0, 0)),
        compiler_params=pltpu.CompilerParams(
            dimension_semantics=("parallel",)),
    )(*args)


# --------------------------------------------------------------------------
# Deterministic parameter init + pure-JAX reference mirroring the PyTorch
# forward (same MXU-operand / fp32-accumulate matmul precision as the kernel).
# --------------------------------------------------------------------------
def init_params(key, image_channels, text_channels, embed_channels):
    keys = iter(jax.random.split(key, 64))
    rnd = lambda shape, s=0.1: jax.random.normal(next(keys), shape, jnp.float32) * s
    p = {}
    p["proj_convs"] = [(rnd((c, embed_channels)), rnd((embed_channels,)))
                       for c in image_channels]
    p["q_ln_g"] = 1.0 + rnd((text_channels,));  p["q_ln_b"] = rnd((text_channels,))
    p["q_w"] = rnd((text_channels, embed_channels)); p["q_b"] = rnd((embed_channels,))
    p["k_ln_g"] = 1.0 + rnd((embed_channels,)); p["k_ln_b"] = rnd((embed_channels,))
    p["k_w"] = rnd((embed_channels, embed_channels)); p["k_b"] = rnd((embed_channels,))
    p["v_ln_g"] = 1.0 + rnd((embed_channels,)); p["v_ln_b"] = rnd((embed_channels,))
    p["v_w"] = rnd((embed_channels, embed_channels)); p["v_b"] = rnd((embed_channels,))
    p["proj_w"] = rnd((embed_channels, text_channels)); p["proj_b"] = rnd((text_channels,))
    return p


def reference_forward(text, image_features, params, num_heads, pool_size=POOL_SIZE):
    mxu, f32 = MXU_DTYPE, jnp.float32
    B = image_features[0].shape[0]
    E = params["q_w"].shape[1]
    pooled = []
    for x, (w, b) in zip(image_features, params["proj_convs"]):
        _, C, H, W = x.shape
        y = jnp.einsum("bchw,ce->behw", x.astype(mxu), w.astype(mxu),
                       preferred_element_type=f32) + b[None, :, None, None]
        y = y.reshape(B, E, pool_size, H // pool_size, pool_size, W // pool_size)
        y = y.max(axis=(3, 5)).reshape(B, E, pool_size * pool_size)
        pooled.append(y)
    mlvl = jnp.concatenate(pooled, axis=-1).transpose(0, 2, 1)      # [B, K, E]

    def ln(x, g, bb):
        mu = x.mean(-1, keepdims=True)
        var = ((x - mu) ** 2).mean(-1, keepdims=True)
        return (x - mu) / jnp.sqrt(var + LN_EPS) * g + bb

    def lin(x, w, bb):
        return jnp.dot(x.astype(mxu), w.astype(mxu),
                       preferred_element_type=f32) + bb

    q = lin(ln(text, params["q_ln_g"], params["q_ln_b"]), params["q_w"], params["q_b"])
    k = lin(ln(mlvl, params["k_ln_g"], params["k_ln_b"]), params["k_w"], params["k_b"])
    v = lin(ln(mlvl, params["v_ln_g"], params["v_ln_b"]), params["v_w"], params["v_b"])
    hc = E // num_heads
    q = (q * hc ** -0.5).reshape(B, -1, num_heads, hc)
    k = k.reshape(B, -1, num_heads, hc)
    v = v.reshape(B, -1, num_heads, hc)
    aw = jnp.einsum("bnmc,bkmc->bmnk", q.astype(mxu), k.astype(mxu),
                    preferred_element_type=f32)
    aw = jax.nn.softmax(aw, axis=-1)
    x = jnp.einsum("bmnk,bkmc->bnmc", aw.astype(mxu), v.astype(mxu),
                   preferred_element_type=f32).reshape(B, -1, E)
    x = jnp.dot(x.astype(mxu), params["proj_w"].astype(mxu),
                preferred_element_type=f32) + params["proj_b"]
    return x * 1.0 + text        # with_scale=False -> scale == 1.0


# --------------------------------------------------------------------------
if __name__ == "__main__":
    B = 2
    num_feats = 3
    num_heads = 8
    image_channels = [4, 8, 16]
    spatial = [(12, 12), (9, 9), (6, 6)]
    text_channels = 32
    embed_channels = 32
    num_text = 8

    key = jax.random.PRNGKey(0)
    k_text, k_img, k_par = jax.random.split(key, 3)

    text = jax.random.normal(k_text, (B, num_text, text_channels), jnp.float32)
    img_keys = jax.random.split(k_img, num_feats)
    image_features = [
        jax.random.normal(ik, (B, c, h, w), jnp.float32)
        for ik, c, (h, w) in zip(img_keys, image_channels, spatial)
    ]
    params = init_params(k_par, image_channels, text_channels, embed_channels)

    out = image_pooling_attention(text, image_features, params, num_heads)
    out = jax.block_until_ready(out)

    ref = reference_forward(text, image_features, params, num_heads)
    assert out.shape == (B, num_text, text_channels)
    assert jnp.allclose(out, ref, atol=2e-3, rtol=2e-3), (
        f"max abs err {jnp.max(jnp.abs(out - ref))}")

    print("KERNEL_OK")
</pallas_src>

<mosaic_0001>
module attributes {stable_mosaic.version = 11 : i64} {
  func.func @_fused_kernel(%arg0: i32, %arg1: memref<1x8x32xf32, #tpu.memory_space<vmem>>, %arg2: memref<1x144x4xf32, #tpu.memory_space<vmem>>, %arg3: memref<1x81x8xf32, #tpu.memory_space<vmem>>, %arg4: memref<1x36x16xf32, #tpu.memory_space<vmem>>, %arg5: memref<4x32xf32, #tpu.memory_space<vmem>>, %arg6: memref<8x32xf32, #tpu.memory_space<vmem>>, %arg7: memref<16x32xf32, #tpu.memory_space<vmem>>, %arg8: memref<1x32xf32, #tpu.memory_space<vmem>>, %arg9: memref<1x32xf32, #tpu.memory_space<vmem>>, %arg10: memref<1x32xf32, #tpu.memory_space<vmem>>, %arg11: memref<1x32xf32, #tpu.memory_space<vmem>>, %arg12: memref<1x32xf32, #tpu.memory_space<vmem>>, %arg13: memref<32x32xf32, #tpu.memory_space<vmem>>, %arg14: memref<1x32xf32, #tpu.memory_space<vmem>>, %arg15: memref<1x32xf32, #tpu.memory_space<vmem>>, %arg16: memref<1x32xf32, #tpu.memory_space<vmem>>, %arg17: memref<32x32xf32, #tpu.memory_space<vmem>>, %arg18: memref<1x32xf32, #tpu.memory_space<vmem>>, %arg19: memref<1x32xf32, #tpu.memory_space<vmem>>, %arg20: memref<1x32xf32, #tpu.memory_space<vmem>>, %arg21: memref<32x32xf32, #tpu.memory_space<vmem>>, %arg22: memref<1x32xf32, #tpu.memory_space<vmem>>, %arg23: memref<32x32xf32, #tpu.memory_space<vmem>>, %arg24: memref<1x32xf32, #tpu.memory_space<vmem>>, %arg25: memref<1x8x32xf32, #tpu.memory_space<vmem>>) attributes {dimension_semantics = [#tpu.dimension_semantics<parallel>], iteration_bounds = array<i64: 2>, scalar_prefetch = 0 : i64, scratch_operands = 0 : i64, tpu.core_type = #tpu.core_type<tc>, window_params = [{transform_indices = @transform_0, window_bounds = array<i64: 1, 8, 32>}, {transform_indices = @transform_1, window_bounds = array<i64: 1, 144, 4>}, {transform_indices = @transform_2, window_bounds = array<i64: 1, 81, 8>}, {transform_indices = @transform_3, window_bounds = array<i64: 1, 36, 16>}, {pipeline_mode = #tpu.pipeline_mode<synchronous>, transform_indices = @transform_4, window_bounds = array<i64: 4, 32>}, {pipeline_mode = #tpu.pipeline_mode<synchronous>, transform_indices = @transform_5, window_bounds = array<i64: 8, 32>}, {pipeline_mode = #tpu.pipeline_mode<synchronous>, transform_indices = @transform_6, window_bounds = array<i64: 16, 32>}, {pipeline_mode = #tpu.pipeline_mode<synchronous>, transform_indices = @transform_7, window_bounds = array<i64: 1, 32>}, {pipeline_mode = #tpu.pipeline_mode<synchronous>, transform_indices = @transform_8, window_bounds = array<i64: 1, 32>}, {pipeline_mode = #tpu.pipeline_mode<synchronous>, transform_indices = @transform_9, window_bounds = array<i64: 1, 32>}, {pipeline_mode = #tpu.pipeline_mode<synchronous>, transform_indices = @transform_10, window_bounds = array<i64: 1, 32>}, {pipeline_mode = #tpu.pipeline_mode<synchronous>, transform_indices = @transform_11, window_bounds = array<i64: 1, 32>}, {pipeline_mode = #tpu.pipeline_mode<synchronous>, transform_indices = @transform_12, window_bounds = array<i64: 32, 32>}, {pipeline_mode = #tpu.pipeline_mode<synchronous>, transform_indices = @transform_13, window_bounds = array<i64: 1, 32>}, {pipeline_mode = #tpu.pipeline_mode<synchronous>, transform_indices = @transform_14, window_bounds = array<i64: 1, 32>}, {pipeline_mode = #tpu.pipeline_mode<synchronous>, transform_indices = @transform_15, window_bounds = array<i64: 1, 32>}, {pipeline_mode = #tpu.pipeline_mode<synchronous>, transform_indices = @transform_16, window_bounds = array<i64: 32, 32>}, {pipeline_mode = #tpu.pipeline_mode<synchronous>, transform_indices = @transform_17, window_bounds = array<i64: 1, 32>}, {pipeline_mode = #tpu.pipeline_mode<synchronous>, transform_indices = @transform_18, window_bounds = array<i64: 1, 32>}, {pipeline_mode = #tpu.pipeline_mode<synchronous>, transform_indices = @transform_19, window_bounds = array<i64: 1, 32>}, {pipeline_mode = #tpu.pipeline_mode<synchronous>, transform_indices = @transform_20, window_bounds = array<i64: 32, 32>}, {pipeline_mode = #tpu.pipeline_mode<synchronous>, transform_indices = @transform_21, window_bounds = array<i64: 1, 32>}, {pipeline_mode = #tpu.pipeline_mode<synchronous>, transform_indices = @transform_22, window_bounds = array<i64: 32, 32>}, {pipeline_mode = #tpu.pipeline_mode<synchronous>, transform_indices = @transform_23, window_bounds = array<i64: 1, 32>}, {transform_indices = @transform_24, window_bounds = array<i64: 1, 8, 32>}]} {
    %c0 = arith.constant 0 : index
    %c0_0 = arith.constant 0 : index
    %c0_1 = arith.constant 0 : index
    %0 = vector.load %arg2[%c0, %c0_0, %c0_1] : memref<1x144x4xf32, #tpu.memory_space<vmem>>, vector<1x144x4xf32>
    %1 = vector.shape_cast %0 : vector<1x144x4xf32> to vector<144x4xf32>
    %c0_2 = arith.constant 0 : index
    %c0_3 = arith.constant 0 : index
    %2 = vector.load %arg5[%c0_2, %c0_3] : memref<4x32xf32, #tpu.memory_space<vmem>>, vector<4x32xf32>
    %cst = arith.constant dense<0.000000e+00> : vector<144x32xf32>
    %3 = tpu.matmul %1, %2, %cst {dimension_numbers = #tpu.dot_dimension_numbers<[1], [0], [0], [1], [0, 0, 1, 1], [], []>} : vector<144x4xf32>, vector<4x32xf32>, vector<144x32xf32> -> vector<144x32xf32>
    %c0_4 = arith.constant 0 : index
    %c0_5 = arith.constant 0 : index
    %4 = vector.load %arg8[%c0_4, %c0_5] : memref<1x32xf32, #tpu.memory_space<vmem>>, vector<1x32xf32>
    %5 = vector.broadcast %4 : vector<1x32xf32> to vector<144x32xf32>
    %6 = arith.addf %3, %5 : vector<144x32xf32>
    %7 = vector.extract_strided_slice %6 {offsets = [0, 0], sizes = [9, 32], strides = [1, 1]} : vector<144x32xf32> to vector<9x32xf32>
    %8 = vector.extract_strided_slice %6 {offsets = [9, 0], sizes = [9, 32], strides = [1, 1]} : vector<144x32xf32> to vector<9x32xf32>
    %9 = arith.maximumf %7, %8 : vector<9x32xf32>
    %10 = vector.extract_strided_slice %6 {offsets = [18, 0], sizes = [9, 32], strides = [1, 1]} : vector<144x32xf32> to vector<9x32xf32>
    %11 = arith.maximumf %9, %10 : vector<9x32xf32>
    %12 = vector.extract_strided_slice %6 {offsets = [27, 0], sizes = [9, 32], strides = [1, 1]} : vector<144x32xf32> to vector<9x32xf32>
    %13 = arith.maximumf %11, %12 : vector<9x32xf32>
    %14 = vector.extract_strided_slice %6 {offsets = [36, 0], sizes = [9, 32], strides = [1, 1]} : vector<144x32xf32> to vector<9x32xf32>
    %15 = arith.maximumf %13, %14 : vector<9x32xf32>
    %16 = vector.extract_strided_slice %6 {offsets = [45, 0], sizes = [9, 32], strides = [1, 1]} : vector<144x32xf32> to vector<9x32xf32>
    %17 = arith.maximumf %15, %16 : vector<9x32xf32>
    %18 = vector.extract_strided_slice %6 {offsets = [54, 0], sizes = [9, 32], strides = [1, 1]} : vector<144x32xf32> to vector<9x32xf32>
    %19 = arith.maximumf %17, %18 : vector<9x32xf32>
    %20 = vector.extract_strided_slice %6 {offsets = [63, 0], sizes = [9, 32], strides = [1, 1]} : vector<144x32xf32> to vector<9x32xf32>
    %21 = arith.maximumf %19, %20 : vector<9x32xf32>
    %22 = vector.extract_strided_slice %6 {offsets = [72, 0], sizes = [9, 32], strides = [1, 1]} : vector<144x32xf32> to vector<9x32xf32>
    %23 = arith.maximumf %21, %22 : vector<9x32xf32>
    %24 = vector.extract_strided_slice %6 {offsets = [81, 0], sizes = [9, 32], strides = [1, 1]} : vector<144x32xf32> to vector<9x32xf32>
    %25 = arith.maximumf %23, %24 : vector<9x32xf32>
    %26 = vector.extract_strided_slice %6 {offsets = [90, 0], sizes = [9, 32], strides = [1, 1]} : vector<144x32xf32> to vector<9x32xf32>
    %27 = arith.maximumf %25, %26 : vector<9x32xf32>
    %28 = vector.extract_strided_slice %6 {offsets = [99, 0], sizes = [9, 32], strides = [1, 1]} : vector<144x32xf32> to vector<9x32xf32>
    %29 = arith.maximumf %27, %28 : vector<9x32xf32>
    %30 = vector.extract_strided_slice %6 {offsets = [108, 0], sizes = [9, 32], strides = [1, 1]} : vector<144x32xf32> to vector<9x32xf32>
    %31 = arith.maximumf %29, %30 : vector<9x32xf32>
    %32 = vector.extract_strided_slice %6 {offsets = [117, 0], sizes = [9, 32], strides = [1, 1]} : vector<144x32xf32> to vector<9x32xf32>
    %33 = arith.maximumf %31, %32 : vector<9x32xf32>
    %34 = vector.extract_strided_slice %6 {offsets = [126, 0], sizes = [9, 32], strides = [1, 1]} : vector<144x32xf32> to vector<9x32xf32>
    %35 = arith.maximumf %33, %34 : vector<9x32xf32>
    %36 = vector.extract_strided_slice %6 {offsets = [135, 0], sizes = [9, 32], strides = [1, 1]} : vector<144x32xf32> to vector<9x32xf32>
    %37 = arith.maximumf %35, %36 : vector<9x32xf32>
    %c0_6 = arith.constant 0 : index
    %c0_7 = arith.constant 0 : index
    %c0_8 = arith.constant 0 : index
    %38 = vector.load %arg3[%c0_6, %c0_7, %c0_8] : memref<1x81x8xf32, #tpu.memory_space<vmem>>, vector<1x81x8xf32>
    %39 = vector.shape_cast %38 : vector<1x81x8xf32> to vector<81x8xf32>
    %c0_9 = arith.constant 0 : index
    %c0_10 = arith.constant 0 : index
    %40 = vector.load %arg6[%c0_9, %c0_10] : memref<8x32xf32, #tpu.memory_space<vmem>>, vector<8x32xf32>
    %cst_11 = arith.constant dense<0.000000e+00> : vector<81x32xf32>
    %41 = tpu.matmul %39, %40, %cst_11 {dimension_numbers = #tpu.dot_dimension_numbers<[1], [0], [0], [1], [0, 0, 1, 1], [], []>} : vector<81x8xf32>, vector<8x32xf32>, vector<81x32xf32> -> vector<81x32xf32>
    %c0_12 = arith.constant 0 : index
    %c0_13 = arith.constant 0 : index
    %42 = vector.load %arg9[%c0_12, %c0_13] : memref<1x32xf32, #tpu.memory_space<vmem>>, vector<1x32xf32>
    %43 = vector.broadcast %42 : vector<1x32xf32> to vector<81x32xf32>
    %44 = arith.addf %41, %43 : vector<81x32xf32>
    %45 = vector.extract_strided_slice %44 {offsets = [0, 0], sizes = [9, 32], strides = [1, 1]} : vector<81x32xf32> to vector<9x32xf32>
    %46 = vector.extract_strided_slice %44 {offsets = [9, 0], sizes = [9, 32], strides = [1, 1]} : vector<81x32xf32> to vector<9x32xf32>
    %47 = arith.maximumf %45, %46 : vector<9x32xf32>
    %48 = vector.extract_strided_slice %44 {offsets = [18, 0], sizes = [9, 32], strides = [1, 1]} : vector<81x32xf32> to vector<9x32xf32>
    %49 = arith.maximumf %47, %48 : vector<9x32xf32>
    %50 = vector.extract_strided_slice %44 {offsets = [27, 0], sizes = [9, 32], strides = [1, 1]} : vector<81x32xf32> to vector<9x32xf32>
    %51 = arith.maximumf %49, %50 : vector<9x32xf32>
    %52 = vector.extract_strided_slice %44 {offsets = [36, 0], sizes = [9, 32], strides = [1, 1]} : vector<81x32xf32> to vector<9x32xf32>
    %53 = arith.maximumf %51, %52 : vector<9x32xf32>
    %54 = vector.extract_strided_slice %44 {offsets = [45, 0], sizes = [9, 32], strides = [1, 1]} : vector<81x32xf32> to vector<9x32xf32>
    %55 = arith.maximumf %53, %54 : vector<9x32xf32>
    %56 = vector.extract_strided_slice %44 {offsets = [54, 0], sizes = [9, 32], strides = [1, 1]} : vector<81x32xf32> to vector<9x32xf32>
    %57 = arith.maximumf %55, %56 : vector<9x32xf32>
    %58 = vector.extract_strided_slice %44 {offsets = [63, 0], sizes = [9, 32], strides = [1, 1]} : vector<81x32xf32> to vector<9x32xf32>
    %59 = arith.maximumf %57, %58 : vector<9x32xf32>
    %60 = vector.extract_strided_slice %44 {offsets = [72, 0], sizes = [9, 32], strides = [1, 1]} : vector<81x32xf32> to vector<9x32xf32>
    %61 = arith.maximumf %59, %60 : vector<9x32xf32>
    %c0_14 = arith.constant 0 : index
    %c0_15 = arith.constant 0 : index
    %c0_16 = arith.constant 0 : index
    %62 = vector.load %arg4[%c0_14, %c0_15, %c0_16] : memref<1x36x16xf32, #tpu.memory_space<vmem>>, vector<1x36x16xf32>
    %63 = vector.shape_cast %62 : vector<1x36x16xf32> to vector<36x16xf32>
    %c0_17 = arith.constant 0 : index
    %c0_18 = arith.constant 0 : index
    %64 = vector.load %arg7[%c0_17, %c0_18] : memref<16x32xf32, #tpu.memory_space<vmem>>, vector<16x32xf32>
    %cst_19 = arith.constant dense<0.000000e+00> : vector<36x32xf32>
    %65 = tpu.matmul %63, %64, %cst_19 {dimension_numbers = #tpu.dot_dimension_numbers<[1], [0], [0], [1], [0, 0, 1, 1], [], []>} : vector<36x16xf32>, vector<16x32xf32>, vector<36x32xf32> -> vector<36x32xf32>
    %c0_20 = arith.constant 0 : index
    %c0_21 = arith.constant 0 : index
    %66 = vector.load %arg10[%c0_20, %c0_21] : memref<1x32xf32, #tpu.memory_space<vmem>>, vector<1x32xf32>
    %67 = vector.broadcast %66 : vector<1x32xf32> to vector<36x32xf32>
    %68 = arith.addf %65, %67 : vector<36x32xf32>
    %69 = vector.extract_strided_slice %68 {offsets = [0, 0], sizes = [9, 32], strides = [1, 1]} : vector<36x32xf32> to vector<9x32xf32>
    %70 = vector.extract_strided_slice %68 {offsets = [9, 0], sizes = [9, 32], strides = [1, 1]} : vector<36x32xf32> to vector<9x32xf32>
    %71 = arith.maximumf %69, %70 : vector<9x32xf32>
    %72 = vector.extract_strided_slice %68 {offsets = [18, 0], sizes = [9, 32], strides = [1, 1]} : vector<36x32xf32> to vector<9x32xf32>
    %73 = arith.maximumf %71, %72 : vector<9x32xf32>
    %74 = vector.extract_strided_slice %68 {offsets = [27, 0], sizes = [9, 32], strides = [1, 1]} : vector<36x32xf32> to vector<9x32xf32>
    %75 = arith.maximumf %73, %74 : vector<9x32xf32>
    %76 = tpu.concatenate %37, %61, %75 in 0 : vector<9x32xf32>, vector<9x32xf32>, vector<9x32xf32> -> vector<27x32xf32>
    %c0_22 = arith.constant 0 : index
    %c0_23 = arith.constant 0 : index
    %c0_24 = arith.constant 0 : index
    %77 = vector.load %arg1[%c0_22, %c0_23, %c0_24] : memref<1x8x32xf32, #tpu.memory_space<vmem>>, vector<1x8x32xf32>
    %78 = vector.shape_cast %77 : vector<1x8x32xf32> to vector<8x32xf32>
    %c0_25 = arith.constant 0 : index
    %c0_26 = arith.constant 0 : index
    %79 = vector.load %arg11[%c0_25, %c0_26] : memref<1x32xf32, #tpu.memory_space<vmem>>, vector<1x32xf32>
    %c0_27 = arith.constant 0 : index
    %c0_28 = arith.constant 0 : index
    %80 = vector.load %arg12[%c0_27, %c0_28] : memref<1x32xf32, #tpu.memory_space<vmem>>, vector<1x32xf32>
    %cst_29 = arith.constant dense<0.000000e+00> : vector<8xf32>
    %81 = vector.multi_reduction <add>, %78, %cst_29 [1] : vector<8x32xf32> to vector<8xf32>
    %82 = vector.shape_cast %81 : vector<8xf32> to vector<8x1xf32>
    %cst_30 = arith.constant 3.200000e+01 : f32
    %83 = vector.broadcast %cst_30 : f32 to vector<8x1xf32>
    %84 = arith.divf %82, %83 : vector<8x1xf32>
    %85 = vector.broadcast %84 : vector<8x1xf32> to vector<8x32xf32>
    %86 = arith.subf %78, %85 : vector<8x32xf32>
    %87 = arith.mulf %86, %86 : vector<8x32xf32>
    %cst_31 = arith.constant dense<0.000000e+00> : vector<8xf32>
    %88 = vector.multi_reduction <add>, %87, %cst_31 [1] : vector<8x32xf32> to vector<8xf32>
    %89 = vector.shape_cast %88 : vector<8xf32> to vector<8x1xf32>
    %cst_32 = arith.constant 3.200000e+01 : f32
    %90 = vector.broadcast %cst_32 : f32 to vector<8x1xf32>
    %91 = arith.divf %89, %90 : vector<8x1xf32>
    %92 = vector.broadcast %84 : vector<8x1xf32> to vector<8x32xf32>
    %93 = arith.subf %78, %92 : vector<8x32xf32>
    %cst_33 = arith.constant 9.99999974E-6 : f32
    %94 = vector.broadcast %cst_33 : f32 to vector<8x1xf32>
    %95 = arith.addf %91, %94 : vector<8x1xf32>
    %96 = math.rsqrt %95 : vector<8x1xf32>
    %97 = vector.broadcast %96 : vector<8x1xf32> to vector<8x32xf32>
    %98 = arith.mulf %93, %97 : vector<8x32xf32>
    %99 = vector.broadcast %79 : vector<1x32xf32> to vector<8x32xf32>
    %100 = arith.mulf %98, %99 : vector<8x32xf32>
    %101 = vector.broadcast %80 : vector<1x32xf32> to vector<8x32xf32>
    %102 = arith.addf %100, %101 : vector<8x32xf32>
    %c0_34 = arith.constant 0 : index
    %c0_35 = arith.constant 0 : index
    %103 = vector.load %arg13[%c0_34, %c0_35] : memref<32x32xf32, #tpu.memory_space<vmem>>, vector<32x32xf32>
    %cst_36 = arith.constant dense<0.000000e+00> : vector<8x32xf32>
    %104 = tpu.matmul %102, %103, %cst_36 {dimension_numbers = #tpu.dot_dimension_numbers<[1], [0], [0], [1], [0, 0, 1, 1], [], []>} : vector<8x32xf32>, vector<32x32xf32>, vector<8x32xf32> -> vector<8x32xf32>
    %c0_37 = arith.constant 0 : index
    %c0_38 = arith.constant 0 : index
    %105 = vector.load %arg14[%c0_37, %c0_38] : memref<1x32xf32, #tpu.memory_space<vmem>>, vector<1x32xf32>
    %106 = vector.broadcast %105 : vector<1x32xf32> to vector<8x32xf32>
    %107 = arith.addf %104, %106 : vector<8x32xf32>
    %c0_39 = arith.constant 0 : index
    %c0_40 = arith.constant 0 : index
    %108 = vector.load %arg15[%c0_39, %c0_40] : memref<1x32xf32, #tpu.memory_space<vmem>>, vector<1x32xf32>
    %c0_41 = arith.constant 0 : index
    %c0_42 = arith.constant 0 : index
    %109 = vector.load %arg16[%c0_41, %c0_42] : memref<1x32xf32, #tpu.memory_space<vmem>>, vector<1x32xf32>
    %cst_43 = arith.constant dense<0.000000e+00> : vector<27xf32>
    %110 = vector.multi_reduction <add>, %76, %cst_43 [1] : vector<27x32xf32> to vector<27xf32>
    %111 = vector.shape_cast %110 : vector<27xf32> to vector<27x1xf32>
    %cst_44 = arith.constant 3.200000e+01 : f32
    %112 = vector.broadcast %cst_44 : f32 to vector<27x1xf32>
    %113 = arith.divf %111, %112 : vector<27x1xf32>
    %114 = vector.broadcast %113 : vector<27x1xf32> to vector<27x32xf32>
    %115 = arith.subf %76, %114 : vector<27x32xf32>
    %116 = arith.mulf %115, %115 : vector<27x32xf32>
    %cst_45 = arith.constant dense<0.000000e+00> : vector<27xf32>
    %117 = vector.multi_reduction <add>, %116, %cst_45 [1] : vector<27x32xf32> to vector<27xf32>
    %118 = vector.shape_cast %117 : vector<27xf32> to vector<27x1xf32>
    %cst_46 = arith.constant 3.200000e+01 : f32
    %119 = vector.broadcast %cst_46 : f32 to vector<27x1xf32>
    %120 = arith.divf %118, %119 : vector<27x1xf32>
    %121 = vector.broadcast %113 : vector<27x1xf32> to vector<27x32xf32>
    %122 = arith.subf %76, %121 : vector<27x32xf32>
    %cst_47 = arith.constant 9.99999974E-6 : f32
    %123 = vector.broadcast %cst_47 : f32 to vector<27x1xf32>
    %124 = arith.addf %120, %123 : vector<27x1xf32>
    %125 = math.rsqrt %124 : vector<27x1xf32>
    %126 = vector.broadcast %125 : vector<27x1xf32> to vector<27x32xf32>
    %127 = arith.mulf %122, %126 : vector<27x32xf32>
    %128 = vector.broadcast %108 : vector<1x32xf32> to vector<27x32xf32>
    %129 = arith.mulf %127, %128 : vector<27x32xf32>
    %130 = vector.broadcast %109 : vector<1x32xf32> to vector<27x32xf32>
    %131 = arith.addf %129, %130 : vector<27x32xf32>
    %c0_48 = arith.constant 0 : index
    %c0_49 = arith.constant 0 : index
    %132 = vector.load %arg17[%c0_48, %c0_49] : memref<32x32xf32, #tpu.memory_space<vmem>>, vector<32x32xf32>
    %cst_50 = arith.constant dense<0.000000e+00> : vector<27x32xf32>
    %133 = tpu.matmul %131, %132, %cst_50 {dimension_numbers = #tpu.dot_dimension_numbers<[1], [0], [0], [1], [0, 0, 1, 1], [], []>} : vector<27x32xf32>, vector<32x32xf32>, vector<27x32xf32> -> vector<27x32xf32>
    %c0_51 = arith.constant 0 : index
    %c0_52 = arith.constant 0 : index
    %134 = vector.load %arg18[%c0_51, %c0_52] : memref<1x32xf32, #tpu.memory_space<vmem>>, vector<1x32xf32>
    %135 = vector.broadcast %134 : vector<1x32xf32> to vector<27x32xf32>
    %136 = arith.addf %133, %135 : vector<27x32xf32>
    %c0_53 = arith.constant 0 : index
    %c0_54 = arith.constant 0 : index
    %137 = vector.load %arg19[%c0_53, %c0_54] : memref<1x32xf32, #tpu.memory_space<vmem>>, vector<1x32xf32>
    %c0_55 = arith.constant 0 : index
    %c0_56 = arith.constant 0 : index
    %138 = vector.load %arg20[%c0_55, %c0_56] : memref<1x32xf32, #tpu.memory_space<vmem>>, vector<1x32xf32>
    %cst_57 = arith.constant dense<0.000000e+00> : vector<27xf32>
    %139 = vector.multi_reduction <add>, %76, %cst_57 [1] : vector<27x32xf32> to vector<27xf32>
    %140 = vector.shape_cast %139 : vector<27xf32> to vector<27x1xf32>
    %cst_58 = arith.constant 3.200000e+01 : f32
    %141 = vector.broadcast %cst_58 : f32 to vector<27x1xf32>
    %142 = arith.divf %140, %141 : vector<27x1xf32>
    %143 = vector.broadcast %142 : vector<27x1xf32> to vector<27x32xf32>
    %144 = arith.subf %76, %143 : vector<27x32xf32>
    %145 = arith.mulf %144, %144 : vector<27x32xf32>
    %cst_59 = arith.constant dense<0.000000e+00> : vector<27xf32>
    %146 = vector.multi_reduction <add>, %145, %cst_59 [1] : vector<27x32xf32> to vector<27xf32>
    %147 = vector.shape_cast %146 : vector<27xf32> to vector<27x1xf32>
    %cst_60 = arith.constant 3.200000e+01 : f32
    %148 = vector.broadcast %cst_60 : f32 to vector<27x1xf32>
    %149 = arith.divf %147, %148 : vector<27x1xf32>
    %150 = vector.broadcast %142 : vector<27x1xf32> to vector<27x32xf32>
    %151 = arith.subf %76, %150 : vector<27x32xf32>
    %cst_61 = arith.constant 9.99999974E-6 : f32
    %152 = vector.broadcast %cst_61 : f32 to vector<27x1xf32>
    %153 = arith.addf %149, %152 : vector<27x1xf32>
    %154 = math.rsqrt %153 : vector<27x1xf32>
    %155 = vector.broadcast %154 : vector<27x1xf32> to vector<27x32xf32>
    %156 = arith.mulf %151, %155 : vector<27x32xf32>
    %157 = vector.broadcast %137 : vector<1x32xf32> to vector<27x32xf32>
    %158 = arith.mulf %156, %157 : vector<27x32xf32>
    %159 = vector.broadcast %138 : vector<1x32xf32> to vector<27x32xf32>
    %160 = arith.addf %158, %159 : vector<27x32xf32>
    %c0_62 = arith.constant 0 : index
    %c0_63 = arith.constant 0 : index
    %161 = vector.load %arg21[%c0_62, %c0_63] : memref<32x32xf32, #tpu.memory_space<vmem>>, vector<32x32xf32>
    %cst_64 = arith.constant dense<0.000000e+00> : vector<27x32xf32>
    %162 = tpu.matmul %160, %161, %cst_64 {dimension_numbers = #tpu.dot_dimension_numbers<[1], [0], [0], [1], [0, 0, 1, 1], [], []>} : vector<27x32xf32>, vector<32x32xf32>, vector<27x32xf32> -> vector<27x32xf32>
    %c0_65 = arith.constant 0 : index
    %c0_66 = arith.constant 0 : index
    %163 = vector.load %arg22[%c0_65, %c0_66] : memref<1x32xf32, #tpu.memory_space<vmem>>, vector<1x32xf32>
    %164 = vector.broadcast %163 : vector<1x32xf32> to vector<27x32xf32>
    %165 = arith.addf %162, %164 : vector<27x32xf32>
    %cst_67 = arith.constant 5.000000e-01 : f32
    %166 = vector.broadcast %cst_67 : f32 to vector<8x32xf32>
    %167 = arith.mulf %107, %166 : vector<8x32xf32>
    %c0_68 = arith.constant 0 : index
    %c0_69 = arith.constant 0 : index
    %168 = vector.load %arg23[%c0_68, %c0_69] : memref<32x32xf32, #tpu.memory_space<vmem>>, vector<32x32xf32>
    %c0_70 = arith.constant 0 : index
    %c0_71 = arith.constant 0 : index
    %169 = vector.load %arg24[%c0_70, %c0_71] : memref<1x32xf32, #tpu.memory_space<vmem>>, vector<1x32xf32>
    %170 = vector.broadcast %169 : vector<1x32xf32> to vector<8x32xf32>
    %171 = arith.addf %78, %170 : vector<8x32xf32>
    %172 = vector.extract_strided_slice %167 {offsets = [0, 0], sizes = [8, 4], strides = [1, 1]} : vector<8x32xf32> to vector<8x4xf32>
    %173 = vector.extract_strided_slice %136 {offsets = [0, 0], sizes = [27, 4], strides = [1, 1]} : vector<27x32xf32> to vector<27x4xf32>
    %174 = vector.extract_strided_slice %165 {offsets = [0, 0], sizes = [27, 4], strides = [1, 1]} : vector<27x32xf32> to vector<27x4xf32>
    %cst_72 = arith.constant dense<0.000000e+00> : vector<8x27xf32>
    %175 = tpu.matmul %172, %173, %cst_72 {dimension_numbers = #tpu.dot_dimension_numbers<[1], [1], [0], [0], [0, 0, 1, 0], [], []>} : vector<8x4xf32>, vector<27x4xf32>, vector<8x27xf32> -> vector<8x27xf32>
    %cst_73 = arith.constant dense<0xFF800000> : vector<8xf32>
    %176 = vector.multi_reduction <maximumf>, %175, %cst_73 [1] : vector<8x27xf32> to vector<8xf32>
    %177 = vector.shape_cast %176 : vector<8xf32> to vector<8x1xf32>
    %178 = vector.broadcast %177 : vector<8x1xf32> to vector<8x27xf32>
    %179 = arith.subf %175, %178 : vector<8x27xf32>
    %180 = math.exp %179 : vector<8x27xf32>
    %cst_74 = arith.constant dense<0.000000e+00> : vector<8xf32>
    %181 = vector.multi_reduction <add>, %180, %cst_74 [1] : vector<8x27xf32> to vector<8xf32>
    %182 = vector.shape_cast %181 : vector<8xf32> to vector<8x1xf32>
    %183 = tpu.reciprocal %182 {approx = true} : vector<8x1xf32> -> vector<8x1xf32>
    %184 = vector.broadcast %183 : vector<8x1xf32> to vector<8x27xf32>
    %185 = arith.mulf %180, %184 : vector<8x27xf32>
    %cst_75 = arith.constant dense<0.000000e+00> : vector<8x4xf32>
    %186 = tpu.matmul %185, %174, %cst_75 {dimension_numbers = #tpu.dot_dimension_numbers<[1], [0], [0], [1], [0, 0, 1, 1], [], []>} : vector<8x27xf32>, vector<27x4xf32>, vector<8x4xf32> -> vector<8x4xf32>
    %187 = vector.extract_strided_slice %168 {offsets = [0, 0], sizes = [4, 32], strides = [1, 1]} : vector<32x32xf32> to vector<4x32xf32>
    %cst_76 = arith.constant dense<0.000000e+00> : vector<8x32xf32>
    %188 = tpu.matmul %186, %187, %cst_76 {dimension_numbers = #tpu.dot_dimension_numbers<[1], [0], [0], [1], [0, 0, 1, 1], [], []>} : vector<8x4xf32>, vector<4x32xf32>, vector<8x32xf32> -> vector<8x32xf32>
    %189 = arith.addf %171, %188 : vector<8x32xf32>
    %190 = vector.extract_strided_slice %167 {offsets = [0, 4], sizes = [8, 4], strides = [1, 1]} : vector<8x32xf32> to vector<8x4xf32>
    %191 = vector.extract_strided_slice %136 {offsets = [0, 4], sizes = [27, 4], strides = [1, 1]} : vector<27x32xf32> to vector<27x4xf32>
    %192 = vector.extract_strided_slice %165 {offsets = [0, 4], sizes = [27, 4], strides = [1, 1]} : vector<27x32xf32> to vector<27x4xf32>
    %cst_77 = arith.constant dense<0.000000e+00> : vector<8x27xf32>
    %193 = tpu.matmul %190, %191, %cst_77 {dimension_numbers = #tpu.dot_dimension_numbers<[1], [1], [0], [0], [0, 0, 1, 0], [], []>} : vector<8x4xf32>, vector<27x4xf32>, vector<8x27xf32> -> vector<8x27xf32>
    %cst_78 = arith.constant dense<0xFF800000> : vector<8xf32>
    %194 = vector.multi_reduction <maximumf>, %193, %cst_78 [1] : vector<8x27xf32> to vector<8xf32>
    %195 = vector.shape_cast %194 : vector<8xf32> to vector<8x1xf32>
    %196 = vector.broadcast %195 : vector<8x1xf32> to vector<8x27xf32>
    %197 = arith.subf %193, %196 : vector<8x27xf32>
    %198 = math.exp %197 : vector<8x27xf32>
    %cst_79 = arith.constant dense<0.000000e+00> : vector<8xf32>
    %199 = vector.multi_reduction <add>, %198, %cst_79 [1] : vector<8x27xf32> to vector<8xf32>
    %200 = vector.shape_cast %199 : vector<8xf32> to vector<8x1xf32>
    %201 = tpu.reciprocal %200 {approx = true} : vector<8x1xf32> -> vector<8x1xf32>
    %202 = vector.broadcast %201 : vector<8x1xf32> to vector<8x27xf32>
    %203 = arith.mulf %198, %202 : vector<8x27xf32>
    %cst_80 = arith.constant dense<0.000000e+00> : vector<8x4xf32>
    %204 = tpu.matmul %203, %192, %cst_80 {dimension_numbers = #tpu.dot_dimension_numbers<[1], [0], [0], [1], [0, 0, 1, 1], [], []>} : vector<8x27xf32>, vector<27x4xf32>, vector<8x4xf32> -> vector<8x4xf32>
    %205 = vector.extract_strided_slice %168 {offsets = [4, 0], sizes = [4, 32], strides = [1, 1]} : vector<32x32xf32> to vector<4x32xf32>
    %cst_81 = arith.constant dense<0.000000e+00> : vector<8x32xf32>
    %206 = tpu.matmul %204, %205, %cst_81 {dimension_numbers = #tpu.dot_dimension_numbers<[1], [0], [0], [1], [0, 0, 1, 1], [], []>} : vector<8x4xf32>, vector<4x32xf32>, vector<8x32xf32> -> vector<8x32xf32>
    %207 = arith.addf %189, %206 : vector<8x32xf32>
    %208 = vector.extract_strided_slice %167 {offsets = [0, 8], sizes = [8, 4], strides = [1, 1]} : vector<8x32xf32> to vector<8x4xf32>
    %209 = vector.extract_strided_slice %136 {offsets = [0, 8], sizes = [27, 4], strides = [1, 1]} : vector<27x32xf32> to vector<27x4xf32>
    %210 = vector.extract_strided_slice %165 {offsets = [0, 8], sizes = [27, 4], strides = [1, 1]} : vector<27x32xf32> to vector<27x4xf32>
    %cst_82 = arith.constant dense<0.000000e+00> : vector<8x27xf32>
    %211 = tpu.matmul %208, %209, %cst_82 {dimension_numbers = #tpu.dot_dimension_numbers<[1], [1], [0], [0], [0, 0, 1, 0], [], []>} : vector<8x4xf32>, vector<27x4xf32>, vector<8x27xf32> -> vector<8x27xf32>
    %cst_83 = arith.constant dense<0xFF800000> : vector<8xf32>
    %212 = vector.multi_reduction <maximumf>, %211, %cst_83 [1] : vector<8x27xf32> to vector<8xf32>
    %213 = vector.shape_cast %212 : vector<8xf32> to vector<8x1xf32>
    %214 = vector.broadcast %213 : vector<8x1xf32> to vector<8x27xf32>
    %215 = arith.subf %211, %214 : vector<8x27xf32>
    %216 = math.exp %215 : vector<8x27xf32>
    %cst_84 = arith.constant dense<0.000000e+00> : vector<8xf32>
    %217 = vector.multi_reduction <add>, %216, %cst_84 [1] : vector<8x27xf32> to vector<8xf32>
    %218 = vector.shape_cast %217 : vector<8xf32> to vector<8x1xf32>
    %219 = tpu.reciprocal %218 {approx = true} : vector<8x1xf32> -> vector<8x1xf32>
    %220 = vector.broadcast %219 : vector<8x1xf32> to vector<8x27xf32>
    %221 = arith.mulf %216, %220 : vector<8x27xf32>
    %cst_85 = arith.constant dense<0.000000e+00> : vector<8x4xf32>
    %222 = tpu.matmul %221, %210, %cst_85 {dimension_numbers = #tpu.dot_dimension_numbers<[1], [0], [0], [1], [0, 0, 1, 1], [], []>} : vector<8x27xf32>, vector<27x4xf32>, vector<8x4xf32> -> vector<8x4xf32>
    %223 = vector.extract_strided_slice %168 {offsets = [8, 0], sizes = [4, 32], strides = [1, 1]} : vector<32x32xf32> to vector<4x32xf32>
    %cst_86 = arith.constant dense<0.000000e+00> : vector<8x32xf32>
    %224 = tpu.matmul %222, %223, %cst_86 {dimension_numbers = #tpu.dot_dimension_numbers<[1], [0], [0], [1], [0, 0, 1, 1], [], []>} : vector<8x4xf32>, vector<4x32xf32>, vector<8x32xf32> -> vector<8x32xf32>
    %225 = arith.addf %207, %224 : vector<8x32xf32>
    %226 = vector.extract_strided_slice %167 {offsets = [0, 12], sizes = [8, 4], strides = [1, 1]} : vector<8x32xf32> to vector<8x4xf32>
    %227 = vector.extract_strided_slice %136 {offsets = [0, 12], sizes = [27, 4], strides = [1, 1]} : vector<27x32xf32> to vector<27x4xf32>
    %228 = vector.extract_strided_slice %165 {offsets = [0, 12], sizes = [27, 4], strides = [1, 1]} : vector<27x32xf32> to vector<27x4xf32>
    %cst_87 = arith.constant dense<0.000000e+00> : vector<8x27xf32>
    %229 = tpu.matmul %226, %227, %cst_87 {dimension_numbers = #tpu.dot_dimension_numbers<[1], [1], [0], [0], [0, 0, 1, 0], [], []>} : vector<8x4xf32>, vector<27x4xf32>, vector<8x27xf32> -> vector<8x27xf32>
    %cst_88 = arith.constant dense<0xFF800000> : vector<8xf32>
    %230 = vector.multi_reduction <maximumf>, %229, %cst_88 [1] : vector<8x27xf32> to vector<8xf32>
    %231 = vector.shape_cast %230 : vector<8xf32> to vector<8x1xf32>
    %232 = vector.broadcast %231 : vector<8x1xf32> to vector<8x27xf32>
    %233 = arith.subf %229, %232 : vector<8x27xf32>
    %234 = math.exp %233 : vector<8x27xf32>
    %cst_89 = arith.constant dense<0.000000e+00> : vector<8xf32>
    %235 = vector.multi_reduction <add>, %234, %cst_89 [1] : vector<8x27xf32> to vector<8xf32>
    %236 = vector.shape_cast %235 : vector<8xf32> to vector<8x1xf32>
    %237 = tpu.reciprocal %236 {approx = true} : vector<8x1xf32> -> vector<8x1xf32>
    %238 = vector.broadcast %237 : vector<8x1xf32> to vector<8x27xf32>
    %239 = arith.mulf %234, %238 : vector<8x27xf32>
    %cst_90 = arith.constant dense<0.000000e+00> : vector<8x4xf32>
    %240 = tpu.matmul %239, %228, %cst_90 {dimension_numbers = #tpu.dot_dimension_numbers<[1], [0], [0], [1], [0, 0, 1, 1], [], []>} : vector<8x27xf32>, vector<27x4xf32>, vector<8x4xf32> -> vector<8x4xf32>
    %241 = vector.extract_strided_slice %168 {offsets = [12, 0], sizes = [4, 32], strides = [1, 1]} : vector<32x32xf32> to vector<4x32xf32>
    %cst_91 = arith.constant dense<0.000000e+00> : vector<8x32xf32>
    %242 = tpu.matmul %240, %241, %cst_91 {dimension_numbers = #tpu.dot_dimension_numbers<[1], [0], [0], [1], [0, 0, 1, 1], [], []>} : vector<8x4xf32>, vector<4x32xf32>, vector<8x32xf32> -> vector<8x32xf32>
    %243 = arith.addf %225, %242 : vector<8x32xf32>
    %244 = vector.extract_strided_slice %167 {offsets = [0, 16], sizes = [8, 4], strides = [1, 1]} : vector<8x32xf32> to vector<8x4xf32>
    %245 = vector.extract_strided_slice %136 {offsets = [0, 16], sizes = [27, 4], strides = [1, 1]} : vector<27x32xf32> to vector<27x4xf32>
    %246 = vector.extract_strided_slice %165 {offsets = [0, 16], sizes = [27, 4], strides = [1, 1]} : vector<27x32xf32> to vector<27x4xf32>
    %cst_92 = arith.constant dense<0.000000e+00> : vector<8x27xf32>
    %247 = tpu.matmul %244, %245, %cst_92 {dimension_numbers = #tpu.dot_dimension_numbers<[1], [1], [0], [0], [0, 0, 1, 0], [], []>} : vector<8x4xf32>, vector<27x4xf32>, vector<8x27xf32> -> vector<8x27xf32>
    %cst_93 = arith.constant dense<0xFF800000> : vector<8xf32>
    %248 = vector.multi_reduction <maximumf>, %247, %cst_93 [1] : vector<8x27xf32> to vector<8xf32>
    %249 = vector.shape_cast %248 : vector<8xf32> to vector<8x1xf32>
    %250 = vector.broadcast %249 : vector<8x1xf32> to vector<8x27xf32>
    %251 = arith.subf %247, %250 : vector<8x27xf32>
    %252 = math.exp %251 : vector<8x27xf32>
    %cst_94 = arith.constant dense<0.000000e+00> : vector<8xf32>
    %253 = vector.multi_reduction <add>, %252, %cst_94 [1] : vector<8x27xf32> to vector<8xf32>
    %254 = vector.shape_cast %253 : vector<8xf32> to vector<8x1xf32>
    %255 = tpu.reciprocal %254 {approx = true} : vector<8x1xf32> -> vector<8x1xf32>
    %256 = vector.broadcast %255 : vector<8x1xf32> to vector<8x27xf32>
    %257 = arith.mulf %252, %256 : vector<8x27xf32>
    %cst_95 = arith.constant dense<0.000000e+00> : vector<8x4xf32>
    %258 = tpu.matmul %257, %246, %cst_95 {dimension_numbers = #tpu.dot_dimension_numbers<[1], [0], [0], [1], [0, 0, 1, 1], [], []>} : vector<8x27xf32>, vector<27x4xf32>, vector<8x4xf32> -> vector<8x4xf32>
    %259 = vector.extract_strided_slice %168 {offsets = [16, 0], sizes = [4, 32], strides = [1, 1]} : vector<32x32xf32> to vector<4x32xf32>
    %cst_96 = arith.constant dense<0.000000e+00> : vector<8x32xf32>
    %260 = tpu.matmul %258, %259, %cst_96 {dimension_numbers = #tpu.dot_dimension_numbers<[1], [0], [0], [1], [0, 0, 1, 1], [], []>} : vector<8x4xf32>, vector<4x32xf32>, vector<8x32xf32> -> vector<8x32xf32>
    %261 = arith.addf %243, %260 : vector<8x32xf32>
    %262 = vector.extract_strided_slice %167 {offsets = [0, 20], sizes = [8, 4], strides = [1, 1]} : vector<8x32xf32> to vector<8x4xf32>
    %263 = vector.extract_strided_slice %136 {offsets = [0, 20], sizes = [27, 4], strides = [1, 1]} : vector<27x32xf32> to vector<27x4xf32>
    %264 = vector.extract_strided_slice %165 {offsets = [0, 20], sizes = [27, 4], strides = [1, 1]} : vector<27x32xf32> to vector<27x4xf32>
    %cst_97 = arith.constant dense<0.000000e+00> : vector<8x27xf32>
    %265 = tpu.matmul %262, %263, %cst_97 {dimension_numbers = #tpu.dot_dimension_numbers<[1], [1], [0], [0], [0, 0, 1, 0], [], []>} : vector<8x4xf32>, vector<27x4xf32>, vector<8x27xf32> -> vector<8x27xf32>
    %cst_98 = arith.constant dense<0xFF800000> : vector<8xf32>
    %266 = vector.multi_reduction <maximumf>, %265, %cst_98 [1] : vector<8x27xf32> to vector<8xf32>
    %267 = vector.shape_cast %266 : vector<8xf32> to vector<8x1xf32>
    %268 = vector.broadcast %267 : vector<8x1xf32> to vector<8x27xf32>
    %269 = arith.subf %265, %268 : vector<8x27xf32>
    %270 = math.exp %269 : vector<8x27xf32>
    %cst_99 = arith.constant dense<0.000000e+00> : vector<8xf32>
    %271 = vector.multi_reduction <add>, %270, %cst_99 [1] : vector<8x27xf32> to vector<8xf32>
    %272 = vector.shape_cast %271 : vector<8xf32> to vector<8x1xf32>
    %273 = tpu.reciprocal %272 {approx = true} : vector<8x1xf32> -> vector<8x1xf32>
    %274 = vector.broadcast %273 : vector<8x1xf32> to vector<8x27xf32>
    %275 = arith.mulf %270, %274 : vector<8x27xf32>
    %cst_100 = arith.constant dense<0.000000e+00> : vector<8x4xf32>
    %276 = tpu.matmul %275, %264, %cst_100 {dimension_numbers = #tpu.dot_dimension_numbers<[1], [0], [0], [1], [0, 0, 1, 1], [], []>} : vector<8x27xf32>, vector<27x4xf32>, vector<8x4xf32> -> vector<8x4xf32>
    %277 = vector.extract_strided_slice %168 {offsets = [20, 0], sizes = [4, 32], strides = [1, 1]} : vector<32x32xf32> to vector<4x32xf32>
    %cst_101 = arith.constant dense<0.000000e+00> : vector<8x32xf32>
    %278 = tpu.matmul %276, %277, %cst_101 {dimension_numbers = #tpu.dot_dimension_numbers<[1], [0], [0], [1], [0, 0, 1, 1], [], []>} : vector<8x4xf32>, vector<4x32xf32>, vector<8x32xf32> -> vector<8x32xf32>
    %279 = arith.addf %261, %278 : vector<8x32xf32>
    %280 = vector.extract_strided_slice %167 {offsets = [0, 24], sizes = [8, 4], strides = [1, 1]} : vector<8x32xf32> to vector<8x4xf32>
    %281 = vector.extract_strided_slice %136 {offsets = [0, 24], sizes = [27, 4], strides = [1, 1]} : vector<27x32xf32> to vector<27x4xf32>
    %282 = vector.extract_strided_slice %165 {offsets = [0, 24], sizes = [27, 4], strides = [1, 1]} : vector<27x32xf32> to vector<27x4xf32>
    %cst_102 = arith.constant dense<0.000000e+00> : vector<8x27xf32>
    %283 = tpu.matmul %280, %281, %cst_102 {dimension_numbers = #tpu.dot_dimension_numbers<[1], [1], [0], [0], [0, 0, 1, 0], [], []>} : vector<8x4xf32>, vector<27x4xf32>, vector<8x27xf32> -> vector<8x27xf32>
    %cst_103 = arith.constant dense<0xFF800000> : vector<8xf32>
    %284 = vector.multi_reduction <maximumf>, %283, %cst_103 [1] : vector<8x27xf32> to vector<8xf32>
    %285 = vector.shape_cast %284 : vector<8xf32> to vector<8x1xf32>
    %286 = vector.broadcast %285 : vector<8x1xf32> to vector<8x27xf32>
    %287 = arith.subf %283, %286 : vector<8x27xf32>
    %288 = math.exp %287 : vector<8x27xf32>
    %cst_104 = arith.constant dense<0.000000e+00> : vector<8xf32>
    %289 = vector.multi_reduction <add>, %288, %cst_104 [1] : vector<8x27xf32> to vector<8xf32>
    %290 = vector.shape_cast %289 : vector<8xf32> to vector<8x1xf32>
    %291 = tpu.reciprocal %290 {approx = true} : vector<8x1xf32> -> vector<8x1xf32>
    %292 = vector.broadcast %291 : vector<8x1xf32> to vector<8x27xf32>
    %293 = arith.mulf %288, %292 : vector<8x27xf32>
    %cst_105 = arith.constant dense<0.000000e+00> : vector<8x4xf32>
    %294 = tpu.matmul %293, %282, %cst_105 {dimension_numbers = #tpu.dot_dimension_numbers<[1], [0], [0], [1], [0, 0, 1, 1], [], []>} : vector<8x27xf32>, vector<27x4xf32>, vector<8x4xf32> -> vector<8x4xf32>
    %295 = vector.extract_strided_slice %168 {offsets = [24, 0], sizes = [4, 32], strides = [1, 1]} : vector<32x32xf32> to vector<4x32xf32>
    %cst_106 = arith.constant dense<0.000000e+00> : vector<8x32xf32>
    %296 = tpu.matmul %294, %295, %cst_106 {dimension_numbers = #tpu.dot_dimension_numbers<[1], [0], [0], [1], [0, 0, 1, 1], [], []>} : vector<8x4xf32>, vector<4x32xf32>, vector<8x32xf32> -> vector<8x32xf32>
    %297 = arith.addf %279, %296 : vector<8x32xf32>
    %298 = vector.extract_strided_slice %167 {offsets = [0, 28], sizes = [8, 4], strides = [1, 1]} : vector<8x32xf32> to vector<8x4xf32>
    %299 = vector.extract_strided_slice %136 {offsets = [0, 28], sizes = [27, 4], strides = [1, 1]} : vector<27x32xf32> to vector<27x4xf32>
    %300 = vector.extract_strided_slice %165 {offsets = [0, 28], sizes = [27, 4], strides = [1, 1]} : vector<27x32xf32> to vector<27x4xf32>
    %cst_107 = arith.constant dense<0.000000e+00> : vector<8x27xf32>
    %301 = tpu.matmul %298, %299, %cst_107 {dimension_numbers = #tpu.dot_dimension_numbers<[1], [1], [0], [0], [0, 0, 1, 0], [], []>} : vector<8x4xf32>, vector<27x4xf32>, vector<8x27xf32> -> vector<8x27xf32>
    %cst_108 = arith.constant dense<0xFF800000> : vector<8xf32>
    %302 = vector.multi_reduction <maximumf>, %301, %cst_108 [1] : vector<8x27xf32> to vector<8xf32>
    %303 = vector.shape_cast %302 : vector<8xf32> to vector<8x1xf32>
    %304 = vector.broadcast %303 : vector<8x1xf32> to vector<8x27xf32>
    %305 = arith.subf %301, %304 : vector<8x27xf32>
    %306 = math.exp %305 : vector<8x27xf32>
    %cst_109 = arith.constant dense<0.000000e+00> : vector<8xf32>
    %307 = vector.multi_reduction <add>, %306, %cst_109 [1] : vector<8x27xf32> to vector<8xf32>
    %308 = vector.shape_cast %307 : vector<8xf32> to vector<8x1xf32>
    %309 = tpu.reciprocal %308 {approx = true} : vector<8x1xf32> -> vector<8x1xf32>
    %310 = vector.broadcast %309 : vector<8x1xf32> to vector<8x27xf32>
    %311 = arith.mulf %306, %310 : vector<8x27xf32>
    %cst_110 = arith.constant dense<0.000000e+00> : vector<8x4xf32>
    %312 = tpu.matmul %311, %300, %cst_110 {dimension_numbers = #tpu.dot_dimension_numbers<[1], [0], [0], [1], [0, 0, 1, 1], [], []>} : vector<8x27xf32>, vector<27x4xf32>, vector<8x4xf32> -> vector<8x4xf32>
    %313 = vector.extract_strided_slice %168 {offsets = [28, 0], sizes = [4, 32], strides = [1, 1]} : vector<32x32xf32> to vector<4x32xf32>
    %cst_111 = arith.constant dense<0.000000e+00> : vector<8x32xf32>
    %314 = tpu.matmul %312, %313, %cst_111 {dimension_numbers = #tpu.dot_dimension_numbers<[1], [0], [0], [1], [0, 0, 1, 1], [], []>} : vector<8x4xf32>, vector<4x32xf32>, vector<8x32xf32> -> vector<8x32xf32>
    %315 = arith.addf %297, %314 : vector<8x32xf32>
    %c0_112 = arith.constant 0 : index
    %c0_113 = arith.constant 0 : index
    %c0_114 = arith.constant 0 : index
    %316 = vector.load %arg25[%c0_112, %c0_113, %c0_114] : memref<1x8x32xf32, #tpu.memory_space<vmem>>, vector<1x8x32xf32>
    %317 = vector.shape_cast %316 : vector<1x8x32xf32> to vector<8x32xf32>
    %318 = vector.shape_cast %315 : vector<8x32xf32> to vector<1x8x32xf32>
    tpu.vector_store %arg25[%c0_112, %c0_113, %c0_114], %318 {strides = array<i32>} : memref<1x8x32xf32, #tpu.memory_space<vmem>>, vector<1x8x32xf32>,
    return
  }
  func.func @transform_0(%arg0: i32) -> (i32, i32, i32) {
    %c0_i32 = arith.constant 0 : i32
    %c0_i32_0 = arith.constant 0 : i32
    %c0_i32_1 = arith.constant 0 : i32
    return %arg0, %c0_i32, %c0_i32_0 : i32, i32, i32
  }
  func.func @transform_1(%arg0: i32) -> (i32, i32, i32) {
    %c0_i32 = arith.constant 0 : i32
    %c0_i32_0 = arith.constant 0 : i32
    %c0_i32_1 = arith.constant 0 : i32
    return %arg0, %c0_i32, %c0_i32_0 : i32, i32, i32
  }
  func.func @transform_2(%arg0: i32) -> (i32, i32, i32) {
    %c0_i32 = arith.constant 0 : i32
    %c0_i32_0 = arith.constant 0 : i32
    %c0_i32_1 = arith.constant 0 : i32
    return %arg0, %c0_i32, %c0_i32_0 : i32, i32, i32
  }
  func.func @transform_3(%arg0: i32) -> (i32, i32, i32) {
    %c0_i32 = arith.constant 0 : i32
    %c0_i32_0 = arith.constant 0 : i32
    %c0_i32_1 = arith.constant 0 : i32
    return %arg0, %c0_i32, %c0_i32_0 : i32, i32, i32
  }
  func.func @transform_4(%arg0: i32) -> (i32, i32) {
    %c0_i32 = arith.constant 0 : i32
    %c0_i32_0 = arith.constant 0 : i32
    %c0_i32_1 = arith.constant 0 : i32
    return %c0_i32, %c0_i32_0 : i32, i32
  }
  func.func @transform_5(%arg0: i32) -> (i32, i32) {
    %c0_i32 = arith.constant 0 : i32
    %c0_i32_0 = arith.constant 0 : i32
    %c0_i32_1 = arith.constant 0 : i32
    return %c0_i32, %c0_i32_0 : i32, i32
  }
  func.func @transform_6(%arg0: i32) -> (i32, i32) {
    %c0_i32 = arith.constant 0 : i32
    %c0_i32_0 = arith.constant 0 : i32
    %c0_i32_1 = arith.constant 0 : i32
    return %c0_i32, %c0_i32_0 : i32, i32
  }
  func.func @transform_7(%arg0: i32) -> (i32, i32) {
    %c0_i32 = arith.constant 0 : i32
    %c0_i32_0 = arith.constant 0 : i32
    %c0_i32_1 = arith.constant 0 : i32
    return %c0_i32, %c0_i32_0 : i32, i32
  }
  func.func @transform_8(%arg0: i32) -> (i32, i32) {
    %c0_i32 = arith.constant 0 : i32
    %c0_i32_0 = arith.constant 0 : i32
    %c0_i32_1 = arith.constant 0 : i32
    return %c0_i32, %c0_i32_0 : i32, i32
  }
  func.func @transform_9(%arg0: i32) -> (i32, i32) {
    %c0_i32 = arith.constant 0 : i32
    %c0_i32_0 = arith.constant 0 : i32
    %c0_i32_1 = arith.constant 0 : i32
    return %c0_i32, %c0_i32_0 : i32, i32
  }
  func.func @transform_10(%arg0: i32) -> (i32, i32) {
    %c0_i32 = arith.constant 0 : i32
    %c0_i32_0 = arith.constant 0 : i32
    %c0_i32_1 = arith.constant 0 : i32
    return %c0_i32, %c0_i32_0 : i32, i32
  }
  func.func @transform_11(%arg0: i32) -> (i32, i32) {
    %c0_i32 = arith.constant 0 : i32
    %c0_i32_0 = arith.constant 0 : i32
    %c0_i32_1 = arith.constant 0 : i32
    return %c0_i32, %c0_i32_0 : i32, i32
  }
  func.func @transform_12(%arg0: i32) -> (i32, i32) {
    %c0_i32 = arith.constant 0 : i32
    %c0_i32_0 = arith.constant 0 : i32
    %c0_i32_1 = arith.constant 0 : i32
    return %c0_i32, %c0_i32_0 : i32, i32
  }
  func.func @transform_13(%arg0: i32) -> (i32, i32) {
    %c0_i32 = arith.constant 0 : i32
    %c0_i32_0 = arith.constant 0 : i32
    %c0_i32_1 = arith.constant 0 : i32
    return %c0_i32, %c0_i32_0 : i32, i32
  }
  func.func @transform_14(%arg0: i32) -> (i32, i32) {
    %c0_i32 = arith.constant 0 : i32
    %c0_i32_0 = arith.constant 0 : i32
    %c0_i32_1 = arith.constant 0 : i32
    return %c0_i32, %c0_i32_0 : i32, i32
  }
  func.func @transform_15(%arg0: i32) -> (i32, i32) {
    %c0_i32 = arith.constant 0 : i32
    %c0_i32_0 = arith.constant 0 : i32
    %c0_i32_1 = arith.constant 0 : i32
    return %c0_i32, %c0_i32_0 : i32, i32
  }
  func.func @transform_16(%arg0: i32) -> (i32, i32) {
    %c0_i32 = arith.constant 0 : i32
    %c0_i32_0 = arith.constant 0 : i32
    %c0_i32_1 = arith.constant 0 : i32
    return %c0_i32, %c0_i32_0 : i32, i32
  }
  func.func @transform_17(%arg0: i32) -> (i32, i32) {
    %c0_i32 = arith.constant 0 : i32
    %c0_i32_0 = arith.constant 0 : i32
    %c0_i32_1 = arith.constant 0 : i32
    return %c0_i32, %c0_i32_0 : i32, i32
  }
  func.func @transform_18(%arg0: i32) -> (i32, i32) {
    %c0_i32 = arith.constant 0 : i32
    %c0_i32_0 = arith.constant 0 : i32
    %c0_i32_1 = arith.constant 0 : i32
    return %c0_i32, %c0_i32_0 : i32, i32
  }
  func.func @transform_19(%arg0: i32) -> (i32, i32) {
    %c0_i32 = arith.constant 0 : i32
    %c0_i32_0 = arith.constant 0 : i32
    %c0_i32_1 = arith.constant 0 : i32
    return %c0_i32, %c0_i32_0 : i32, i32
  }
  func.func @transform_20(%arg0: i32) -> (i32, i32) {
    %c0_i32 = arith.constant 0 : i32
    %c0_i32_0 = arith.constant 0 : i32
    %c0_i32_1 = arith.constant 0 : i32
    return %c0_i32, %c0_i32_0 : i32, i32
  }
  func.func @transform_21(%arg0: i32) -> (i32, i32) {
    %c0_i32 = arith.constant 0 : i32
    %c0_i32_0 = arith.constant 0 : i32
    %c0_i32_1 = arith.constant 0 : i32
    return %c0_i32, %c0_i32_0 : i32, i32
  }
  func.func @transform_22(%arg0: i32) -> (i32, i32) {
    %c0_i32 = arith.constant 0 : i32
    %c0_i32_0 = arith.constant 0 : i32
    %c0_i32_1 = arith.constant 0 : i32
    return %c0_i32, %c0_i32_0 : i32, i32
  }
  func.func @transform_23(%arg0: i32) -> (i32, i32) {
    %c0_i32 = arith.constant 0 : i32
    %c0_i32_0 = arith.constant 0 : i32
    %c0_i32_1 = arith.constant 0 : i32
    return %c0_i32, %c0_i32_0 : i32, i32
  }
  func.func @transform_24(%arg0: i32) -> (i32, i32, i32) {
    %c0_i32 = arith.constant 0 : i32
    %c0_i32_0 = arith.constant 0 : i32
    %c0_i32_1 = arith.constant 0 : i32
    return %arg0, %c0_i32, %c0_i32_0 : i32, i32, i32
  }
}

</mosaic_0001>

<bundles_post_ra>
// kernel: tpu_custom_call.1
= control target key start
LH: loop header
LB: loop body
LE: loop exit
PB: predicated region body
PF: predicated region fallthrough
CT: control target
= control target key end

     0   :  { %s3766_s0 = inlined_call_operand.vmem [shape: f32[2,8,32], index: 0, kind: input, shape index: {}]   ;;  %s3767_s1 = inlined_call_operand.vmem [shape: f32[2,144,4], index: 1, kind: input, shape index: {}]   ;;  %s3768_s2 = inlined_call_operand.vmem [shape: f32[2,81,8], index: 2, kind: input, shape index: {}]   ;;  %s3769_s3 = inlined_call_operand.vmem [shape: f32[2,36,16], index: 3, kind: input, shape index: {}]   ;;  %s3770_s4 = inlined_call_operand.vmem [shape: f32[4,32], index: 4, kind: input, shape index: {}]   ;;  %s3771_s5 = inlined_call_operand.vmem [shape: f32[8,32], index: 5, kind: input, shape index: {}]   ;;  %s3772_s6 = inlined_call_operand.vmem [shape: f32[16,32], index: 6, kind: input, shape index: {}]   ;;  %s3773_s7 = inlined_call_operand.vmem [shape: f32[1,32], index: 7, kind: input, shape index: {}]   ;;  %s3774_s8 = inlined_call_operand.vmem [shape: f32[1,32], index: 8, kind: input, shape index: {}]   ;;  %s3775_s9 = inlined_call_operand.vmem [shape: f32[1,32], index: 9, kind: input, shape index: {}]   ;;  %s3776_s10 = inlined_call_operand.vmem [shape: f32[1,32], index: 10, kind: input, shape index: {}]   ;;  %s3777_s11 = inlined_call_operand.vmem [shape: f32[1,32], index: 11, kind: input, shape index: {}]   ;;  %s3778_s12 = inlined_call_operand.vmem [shape: f32[32,32], index: 12, kind: input, shape index: {}]   ;;  %s3779_s13 = inlined_call_operand.vmem [shape: f32[1,32], index: 13, kind: input, shape index: {}]   ;;  %s3780_s14 = inlined_call_operand.vmem [shape: f32[1,32], index: 14, kind: input, shape index: {}]   ;;  %s3781_s15 = inlined_call_operand.vmem [shape: f32[1,32], index: 15, kind: input, shape index: {}]   ;;  %s3782_s16 = inlined_call_operand.vmem [shape: f32[32,32], index: 16, kind: input, shape index: {}]   ;;  %s3783_s17 = inlined_call_operand.vmem [shape: f32[1,32], index: 17, kind: input, shape index: {}]   ;;  %s3784_s18 = inlined_call_operand.vmem [shape: f32[1,32], index: 18, kind: input, shape index: {}]   ;;  %s3785_s19 = inlined_call_operand.vmem [shape: f32[1,32], index: 19, kind: input, shape index: {}]   ;;  %s3786_s20 = inlined_call_operand.vmem [shape: f32[32,32], index: 20, kind: input, shape index: {}]   ;;  %s3787_s21 = inlined_call_operand.vmem [shape: f32[1,32], index: 21, kind: input, shape index: {}]   ;;  %s3788_s22 = inlined_call_operand.vmem [shape: f32[32,32], index: 22, kind: input, shape index: {}]   ;;  %s3789_s23 = inlined_call_operand.vmem [shape: f32[1,32], index: 23, kind: input, shape index: {}]   ;;  %s3790_s24 = inlined_call_operand.hbm [shape: f32[2,8,32], index: 24, kind: output, shape index: {}]  }
   0x1   :  { %3803 = sst [smem:[#allocation13_spill]] %s3766_s0 }
   0x2   :  { %3804 = sst [smem:[#allocation14_spill]] %s3767_s1 }
   0x3   :  { %3805 = sst [smem:[#allocation15_spill]] %s3768_s2 }
   0x4   :  { %3806 = sst [smem:[#allocation16_spill]] %s3769_s3 }
   0x5   :  { %3807 = sst [smem:[#allocation17_spill]] %s3770_s4 }
   0x6   :  { %3808 = sst [smem:[#allocation18_spill]] %s3771_s5 }
   0x7   :  { %3809 = sst [smem:[#allocation19_spill]] %s3772_s6 }
   0x8   :  { %3810 = sst [smem:[#allocation20_spill]] %s3773_s7 }
   0x9   :  { %3811 = sst [smem:[#allocation21_spill]] %s3774_s8 }
   0xa   :  { %3812 = sst [smem:[#allocation22_spill]] %s3775_s9 }
   0xb   :  { %3813 = sst [smem:[#allocation23_spill]] %s3790_s24 }
   0xc   :  { %29 = vsyncpa [#allocation3], 0 }
   0xd   :  { %31 = vsyncpa [#allocation3 + $0x1], 0  ;;  %s3110_s5 = smov 0   ;;  %s3112_s26 = smov 0  }
   0xe   :  { %s3114_s27 = smov 0   ;;  %s3116_s28 = smov 0  }
   0xf LB: > { %3814 = sst [smem:[#allocation5_spill]] %s2963_s5  ;;  %s3131_s6 = sadd.s32 4294967295, %s2975_s28   ;;  %s2975_s28 = sphi %s3116_s28, %s3840_s28   ;;  %s2971_s27 = sphi %s3114_s27, %s3842_s27   ;;  %s2967_s26 = sphi %s3112_s26, %s3844_s26   ;;  %s2963_s5 = sphi %s3110_s5, %s3843_s5  }
  0x10   : > { %3815 = sst [smem:[#allocation6_spill]] %s2971_s27  ;;  %s2641_s2 = sadd.s32 4294967294, %s2975_s28  }
  0x11   : > { %3816 = sst [smem:[#allocation7_spill]] %s2975_s28  ;;  %s3135_s29 = sadd.s32 1, %s2975_s28  }
  0x12   : > { %3817 = sst [smem:[#allocation8_spill]] %s3131_s6  ;;  %s568_s0 = sadd.s32 1, %s2971_s27 }
  0x13   : > { %3818 = sst [smem:[#allocation9_spill]] %s3135_s29  ;;  %s565_s7 = ssub.s32 %s2975_s28, %s3135_s29 }
  0x14   : > { %p578_p0 = scmp.ne.s32.totalorder %s2971_s27, %s2967_s26  ;;  %p566_p1 = scmp.eq.s32.totalorder %s565_s7, 0 }
  0x15   : > { %p579_p2 = scmp.eq.s32.totalorder %s3131_s6, 1  ;;  %p584_p3 = scmp.ne.s32.totalorder %s2967_s26, %s2963_s5 }
  0x16   : > { %p585_p4 = scmp.eq.s32.totalorder %s2641_s2, 1  ;;  %p2644_p7 = scmp.ge.s32.totalorder %s2975_s28, 1 }
  0x17   : > { %s3146_s30 = scalar_select %p566_p1, %s2971_s27, %s568_s0  }
  0x18   : > { %p3148_p5 = por %p579_p2, %p578_p0  ;;  %p3152_p6 = por %p585_p4, %p584_p3 }
  0x19   : > { %3819 = sst [smem:[#allocation10_spill]] %s3146_s30  ;;  %p694_p8 = scmp.lt.s32.totalorder %s2975_s28, 3 }
  0x1a   : > { %s3820_s3 = scalar_select %p3148_p5, 1, 0 }
  0x1b   : > { %s3822_s25 = scalar_select %p3152_p6, 1, 0 }
  0x1c   : > { %3821 = sst [smem:[#allocation11_spill]] %s3820_s3  ;;  %p695_p9 = pnand %p2644_p7, %p694_p8 }
  0x1d   : > { %3823 = sst [smem:[#allocation12_spill]] %s3822_s25  ;;  %p774_p10 = scmp.lt.s32.totalorder (!%p695_p9), %s3131_s6, 1 }
  0x1e   : > { %698 = sbr.rel (%p695_p9) target bundleno = 3509 (0xdb5), region = 116  ;;  %s3824_s1 = sld [smem:[#allocation19_spill]] (!%p695_p9) }
  0x1f   : > { %s3825_s7 = sld [smem:[#allocation17_spill]] (!%p695_p9) }
  0x20   : > { %s3826_s5 = sld [smem:[#allocation18_spill]] (!%p695_p9) }
  0x21   : > { %s3827_s0 = sld [smem:[#allocation14_spill]] (!%p695_p9) }
  0x22   : > { %s3830_s3 = sld [smem:[#allocation13_spill]] (!%p695_p9) }
  0x23   : > { %vm871_vm0 = vcmask 1043456   ;;  %s3173_s8 = scalar_select %p774_p10, %s3131_s6, 1  ;;  %vm816_vm1 = vcmask 31744   ;;  %vm1238_vm2 = vcmask 130048   ;;  %vm1084_vm3 = vcmask 64512  }
  0x24   : > { %v1233_v0 = vld [vmem:[%s3824_s1 + $0x8] sm:$0xff]  ;;  %v1232_v2 = vld [vmem:[%s3824_s1] sm:$0xff]  ;;  %s3828_s1 = sld [smem:[#allocation16_spill]]  ;;  %vm1330_vm4 = vcmask 261120   ;;  %vm948_vm5 = vcmask 1046528   ;;  %vm957_vm6 = vcmask 1045504  }
  0x25   : > { %v811_v1 = vld [vmem:[%s3825_s7] sm:$0xf]  ;;  %1268 = vmatpush.msra.mxu2 %v1233_v0  ;;  %s2770_s4 = smul.u32 144, %s3173_s8  ;;  %s3829_s6 = sld [smem:[#allocation15_spill]]  ;;  %vm966_vm7 = vcmask 1044480   ;;  %vm992_vm8 = vcmask 1041408  }
  0x26   : > { %2650 = vmatpush.msk.msra.mxu0 %vm871_vm0, %v811_v1  ;;  %v1079_v3 = vld [vmem:[%s3826_s5] sm:$0xff]  ;;  %s2772_s2 = smul.u32 40, %s3173_s8  ;;  %s2646_s24 = sshll.u32 %s3173_s8, 3  ;;  %vm1410_vm9 = vcmask 256000   ;;  %vm983_vm10 = vcmask 1042432   ;;  %vm1001_vm12 = vcmask 1040384  }
  0x27   : > { %1133 = vmatpush.msra.mxu1 %v1079_v3  ;;  %1269 = vmatpush.msra.mxu2 %v1232_v2  ;;  %s3180_s7 = scalar_lea.vmem %s3827_s0, %s2770_s4  ;;  %s2771_s29 = smul.u32 88, %s3173_s8 }
  0x28   : > { %v793_v4 = vld [vmem:[%s3180_s7] sm:$0xff]  ;;  %v794_v7 = vld [vmem:[%s3180_s7 + $0x8] sm:$0xff]  ;;  %v795_v10 = vld [vmem:[%s3180_s7 + $0x10] sm:$0xff]  ;;  %s3832_s9 = sld [smem:[#allocation22_spill]]  ;;  %s2978_s0 = smov 120  }
  0x29   : > { %2651 = vmatmul.msk.f32.vlgmr.msra.gmra.mxu0 %vm816_vm1, %v793_v4  ;;  %v796_v13 = vld [vmem:[%s3180_s7 + $0x18] sm:$0xff]  ;;  %v797_v16 = vld [vmem:[%s3180_s7 + $0x20] sm:$0xff]  ;;  %v798_v19 = vld [vmem:[%s3180_s7 + $0x28] sm:$0xff]  ;;  %s3833_s5 = sld [smem:[#allocation21_spill]] }
  0x2a   : > { %s792_s28 = scalar_lea.vmem %s3828_s1, %s2772_s2  ;;  %v799_v21 = vld [vmem:[%s3180_s7 + $0x30] sm:$0xff]  ;;  %v800_v23 = vld [vmem:[%s3180_s7 + $0x38] sm:$0xff]  ;;  %v801_v25 = vld [vmem:[%s3180_s7 + $0x40] sm:$0xff]  ;;  %s3245_s1 = scalar_lea.vmem %s3830_s3, %s2646_s24 }
  0x2b   : > { %v1227_v5 = vld [vmem:[%s792_s28] sm:$0xff]  ;;  %s3191_s27 = scalar_lea.vmem %s3829_s6, %s2771_s29  ;;  %v1228_v8 = vld [vmem:[%s792_s28 + $0x8] sm:$0xff]  ;;  %v1229_v11 = vld [vmem:[%s792_s28 + $0x10] sm:$0xff]  ;;  %s3831_s2 = sld [smem:[#allocation20_spill]] }
  0x2c   : > { %2680 = vmatmul.msk.f32.vlgmr.msra.gmra.mxu2 %vm1238_vm2, %v1227_v5  ;;  %v1068_v6 = vld [vmem:[%s3191_s27] sm:$0xff]  ;;  %v1069_v9 = vld [vmem:[%s3191_s27 + $0x8] sm:$0xff]  ;;  %v1070_v12 = vld [vmem:[%s3191_s27 + $0x10] sm:$0xff]  ;;  %s2980_s24 = smov 116  }
  0x2d   : > { %2669 = vmatmul.msk.f32.vlgmr.msra.gmra.mxu1 %vm1084_vm3, %v1068_v6  ;;  %v1230_v14 = vld [vmem:[%s792_s28 + $0x18] sm:$0xff]  ;;  %v1231_v17 = vld [vmem:[%s792_s28 + $0x20] sm:$0xf]  ;;  %v1073_v20 = vld [vmem:[%s3191_s27 + $0x28] sm:$0xff]  ;;  %s2981_s28 = smov 112  }
  0x2e   : > { %v1071_v15 = vld [vmem:[%s3191_s27 + $0x18] sm:$0xff]  ;;  %v1072_v18 = vld [vmem:[%s3191_s27 + $0x20] sm:$0xff]  ;;  %v1074_v22 = vld [vmem:[%s3191_s27 + $0x30] sm:$0xff] }
  0x2f   : > { %v1075_v24 = vld [vmem:[%s3191_s27 + $0x38] sm:$0xff]  ;;  %v1076_v26 = vld [vmem:[%s3191_s27 + $0x40] sm:$0xff]  ;;  %v802_v27 = vld [vmem:[%s3180_s7 + $0x48] sm:$0xff] }
  0x30   : > { %v1077_v28 = vld [vmem:[%s3191_s27 + $0x48] sm:$0xff]  ;;  %v803_v29 = vld [vmem:[%s3180_s7 + $0x50] sm:$0xff]  ;;  %v804_v31 = vld [vmem:[%s3180_s7 + $0x58] sm:$0xff] }
  0x31   : > { %2652 = vmatmul.msk.f32.gmra.mxu0 %vm816_vm1, %v794_v7  ;;  %v1078_v30 = vld [vmem:[%s3191_s27 + $0x50] sm:$0x1]  ;;  %v3249_v32 = vld [vmem:[%s3245_s1] sm:$0xff]  ;;  %v806_v35 = vld [vmem:[%s3180_s7 + $0x68] sm:$0xff]  ;;  %s2979_s27 = smov 124  }
  0x32   : > { %v1331_v33 = vsel %vm1330_vm4, %v3249_v32, 0.0  ;;  %v805_v34 = vld [vmem:[%s3180_s7 + $0x60] sm:$0xff]  ;;  %v807_v36 = vld [vmem:[%s3180_s7 + $0x70] sm:$0xff]  ;;  %v808_v37 = vld [vmem:[%s3180_s7 + $0x78] sm:$0xff] }
  0x33   : > { %1332 = vadd.xlane.f32.xlu0 %v1331_v33  ;;  %v809_v39 = vld [vmem:[%s3180_s7 + $0x80] sm:$0xff]  ;;  %v810_v42 = vld [vmem:[%s3180_s7 + $0x88] sm:$0xff] }
  0x34   : > { %2681 = vmatmul.msk.f32.gmra.mxu2 %vm1238_vm2, %v1228_v8  ;;  %v3268_v43 = vld [vmem:[%s3831_s2] ss:$0 sm:$0xff]  ;;  %s2982_s2 = smov 108  }
  0x35   : > { %2670 = vmatmul.msk.f32.gmra.mxu1 %vm1084_vm3, %v1069_v9  ;;  %v2857_v54 = vld [vmem:[%s3832_s9] ss:$0 sm:$0xff] }
  0x39   : > { %2653 = vmatmul.msk.f32.gmra.mxu0 %vm816_vm1, %v795_v10 }
  0x3c   : > { %2682 = vmatmul.msk.f32.gmra.mxu2 %vm1238_vm2, %v1229_v11 }
  0x3d   : > { %2671 = vmatmul.msk.f32.gmra.mxu1 %vm1084_vm3, %v1070_v12 }
  0x41   : > { %2654 = vmatmul.msk.f32.gmra.mxu0 %vm816_vm1, %v796_v13 }
  0x44   : > { %2683 = vmatmul.msk.f32.gmra.mxu2 %vm1238_vm2, %v1230_v14 }
  0x45   : > { %2672 = vmatmul.msk.f32.gmra.mxu1 %vm1084_vm3, %v1071_v15 }
  0x49   : > { %2655 = vmatmul.msk.f32.gmra.mxu0 %vm816_vm1, %v797_v16 }
  0x4c   : > { %2684 = vmatmul.msk.f32.gmra.mxu2 %vm1238_vm2, %v1231_v17 }
  0x4d   : > { %2673 = vmatmul.msk.f32.gmra.mxu1 %vm1084_vm3, %v1072_v18 }
  0x51   : > { %2656 = vmatmul.msk.f32.gmra.mxu0 %vm816_vm1, %v798_v19 }
  0x55   : > { %2674 = vmatmul.msk.f32.gmra.mxu1 %vm1084_vm3, %v1073_v20 }
  0x59   : > { %2657 = vmatmul.msk.f32.gmra.mxu0 %vm816_vm1, %v799_v21 }
  0x5d   : > { %2675 = vmatmul.msk.f32.gmra.mxu1 %vm1084_vm3, %v1074_v22 }
  0x61   : > { %2658 = vmatmul.msk.f32.gmra.mxu0 %vm816_vm1, %v800_v23 }
  0x65   : > { %2676 = vmatmul.msk.f32.gmra.mxu1 %vm1084_vm3, %v1075_v24 }
  0x69   : > { %2659 = vmatmul.msk.f32.gmra.mxu0 %vm816_vm1, %v801_v25 }
  0x6d   : > { %2677 = vmatmul.msk.f32.gmra.mxu1 %vm1084_vm3, %v1076_v26 }
  0x71   : > { %2660 = vmatmul.msk.f32.gmra.mxu0 %vm816_vm1, %v802_v27 }
  0x75   : > { %2678 = vmatmul.msk.f32.gmra.mxu1 %vm1084_vm3, %v1077_v28 }
  0x79   : > { %2661 = vmatmul.msk.f32.gmra.mxu0 %vm816_vm1, %v803_v29 }
  0x7d   : > { %2679 = vmatmul.msk.f32.gmra.mxu1 %vm1084_vm3, %v1078_v30 }
  0x81   : > { %2662 = vmatmul.msk.f32.gmra.mxu0 %vm816_vm1, %v804_v31 }
  0x89   : > { %2663 = vmatmul.msk.f32.gmra.mxu0 %vm816_vm1, %v805_v34 }
  0x91   : > { %2664 = vmatmul.msk.f32.gmra.mxu0 %vm816_vm1, %v806_v35 }
  0x99   : > { %2665 = vmatmul.msk.f32.gmra.mxu0 %vm816_vm1, %v807_v36 }
  0xa1   : > { %2666 = vmatmul.msk.f32.gmra.mxu0 %vm816_vm1, %v808_v37 }
  0xa6   : > { %v892_v38 = vpop.f32.mrf.mxu0 }
  0xa7   : > { %v893_v50 = vadd.f32 %v3268_v43, %v892_v38 }
  0xa9   : > { %2667 = vmatmul.msk.f32.gmra.mxu0 %vm816_vm1, %v809_v39 }
  0xaa   : > { %v3279_v1 = vpop.f32.mrf.mxu1 }
  0xae   : > { %v895_v41 = vpop.f32.mrf.mxu0 }
  0xaf   : > { %v1271_v40 = vpop.f32.mrf.mxu2  ;;  %v896_v44 = vadd.f32 %v3268_v43, %v895_v41 }
  0xb0   : > { %v1272_v8 = vadd.f32 %v2857_v54, %v1271_v40 }
  0xb1   : > { %2668 = vmatmul.msk.f32.gmra.mxu0 %vm816_vm1, %v810_v42  ;;  %v949_v48 = vrot.slane %v896_v44, 1 }
  0xb2   : > { %v1138_v25 = vpop.f32.mrf.mxu1 }
  0xb6   : > { %v898_v46 = vpop.f32.mrf.mxu0 }
  0xb7   : > { %v1274_v45 = vpop.f32.mrf.mxu2  ;;  %v899_v47 = vadd.f32 %v3268_v43, %v898_v46 }
  0xb8   : > { %v1275_v58 = vadd.f32 %v2857_v54, %v1274_v45 }
  0xb9   : > { %v950_v49 = vrot.slane %v899_v47, 1  ;;  %v958_v59 = vrot.slane %v899_v47, 2 }
  0xba   : > { %v1288_v2 = vrot.slane %v1275_v58, 1 }
  0xbb   : > { %v951_v51 = vsel %vm948_vm5, %v949_v48, %v950_v49  ;;  %v955_v52 = vmax.f32 %v896_v44, %v950_v49  ;;  %v1141_v44 = vpop.f32.mrf.mxu1 }
  0xbc   : > { %v954_v53 = vmax.f32 %v893_v50, %v951_v51 }
  0xbe   : > { %v901_v56 = vpop.f32.mrf.mxu0 }
  0xbf   : > { %v1277_v55 = vpop.f32.mrf.mxu2  ;;  %v902_v57 = vadd.f32 %v3268_v43, %v901_v56 }
  0xc0   : > { %v1278_v60 = vadd.f32 %v2857_v54, %v1277_v55 }
  0xc1   : > { %v959_v61 = vrot.slane %v902_v57, 2  ;;  %v967_v11 = vrot.slane %v902_v57, 3 }
  0xc2   : > { %v1289_v3 = vrot.slane %v1278_v60, 1  ;;  %v1296_v9 = vrot.slane %v1278_v60, 2 }
  0xc3   : > { %v960_v62 = vsel %vm957_vm6, %v958_v59, %v959_v61  ;;  %v964_v63 = vmax.f32 %v955_v52, %v959_v61  ;;  %v1144_v55 = vpop.f32.mrf.mxu1  ;;  %v2977_v59 = vmov 32.0  }
  0xc4   : > { %v963_v0 = vmax.f32 %v954_v53, %v960_v62  ;;  %v1290_v10 = vsel %vm948_vm5, %v1288_v2, %v1289_v3  ;;  %v1294_v14 = vmax.f32 %v1275_v58, %v1289_v3  ;;  %2868 = vrcp.f32 %v2977_v59 }
  0xc5   : > { %v1293_v17 = vmax.f32 %v1272_v8, %v1290_v10 }
  0xc6   : > { %v904_v6 = vpop.f32.mrf.mxu0 }
  0xc7   : > { %v1280_v4 = vpop.f32.mrf.mxu2  ;;  %v905_v7 = vadd.f32 %v3268_v43, %v904_v6 }
  0xc8   : > { %v1281_v5 = vadd.f32 %v2857_v54, %v1280_v4 }
  0xc9   : > { %v968_v13 = vrot.slane %v905_v7, 3  ;;  %v975_v29 = vrot.slane %v905_v7, 4 }
  0xca   : > { %v1297_v12 = vrot.slane %v1281_v5, 2  ;;  %v1304_v22 = vrot.slane %v1281_v5, 3  ;;  %v2869_v61 = vpop.eup %2868  ;;  %v1333_v5 = vpop.xlane.xlu0 %1332 }
  0xcb   : > { %v969_v15 = vsel %vm966_vm7, %v967_v11, %v968_v13  ;;  %v973_v16 = vmax.f32 %v964_v63, %v968_v13  ;;  %v1147_v60 = vpop.f32.mrf.mxu1  ;;  %v1335_v63 = vmul.f32 32.0, %v2869_v61  ;;  %vm1339_vm11 = vweird.f32 %v2869_v61 }
  0xcc   : > { %v972_v18 = vmax.f32 %v963_v0, %v969_v15  ;;  %v1298_v19 = vsel %vm957_vm6, %v1296_v9, %v1297_v12  ;;  %v1302_v21 = vmax.f32 %v1294_v14, %v1297_v12  ;;  %v3323_v14 = vld [vmem:[%s3833_s5] ss:$0 sm:$0xff]  ;;  %s2984_s5 = smov 100  }
  0xcd   : > { %v1301_v28 = vmax.f32 %v1293_v17, %v1298_v19  ;;  %v1336_v0 = vsub.f32 1.0, %v1335_v63  ;;  %v1139_v15 = vadd.f32 %v3323_v14, %v1138_v25  ;;  %v1145_v19 = vadd.f32 %v3323_v14, %v1144_v55 }
  0xce   : > { %v907_v24 = vpop.f32.mrf.mxu0 }
  0xcf   : > { %v1283_v20 = vpop.f32.mrf.mxu2  ;;  %v908_v26 = vadd.f32 %v3268_v43, %v907_v24  ;;  %v1337_v2 = vmul.f32 %v2869_v61, %v1336_v0  ;;  %v1179_v24 = vrot.slane %v1145_v19, 2 }
  0xd0   : > { %v1284_v23 = vadd.f32 %v2857_v54, %v1283_v20 }
  0xd1   : > { %v976_v30 = vrot.slane %v908_v26, 4  ;;  %v984_v45 = vrot.slane %v908_v26, 5  ;;  %v1338_v3 = vadd.f32 %v2869_v61, %v1337_v2  ;;  %v1148_v26 = vadd.f32 %v3323_v14, %v1147_v60 }
  0xd2   : > { %v1305_v27 = vrot.slane %v1284_v23, 3 }
  0xd3   : > { %v977_v34 = vsel %vm871_vm0, %v975_v29, %v976_v30  ;;  %v981_v35 = vmax.f32 %v973_v16, %v976_v30  ;;  %v1150_v6 = vpop.f32.mrf.mxu1  ;;  %v3311_v7 = vsel %vm1339_vm11, %v2869_v61, %v1338_v3  ;;  %v1142_v16 = vadd.f32 %v3323_v14, %v1141_v44 }
  0xd4   : > { %v1306_v31 = vsel %vm966_vm7, %v1304_v22, %v1305_v27  ;;  %v1310_v33 = vmax.f32 %v1302_v21, %v1305_v27  ;;  %v980_v37 = vmax.f32 %v972_v18, %v977_v34  ;;  %v1341_v8 = vmul.f32 %v3311_v7, %v1333_v5 }
  0xd5   : > { %v1309_v38 = vmax.f32 %v1301_v28, %v1306_v31  ;;  %v1171_v18 = vrot.slane %v1142_v16, 1  ;;  %v1136_v21 = vadd.f32 %v3323_v14, %v3279_v1  ;;  %v1178_v23 = vrot.slane %v1142_v16, 2 }
  0xd6   : > { %v1321_v36 = vrot.slane %v1310_v33, 6  ;;  %v910_v39 = vpop.f32.mrf.mxu0  ;;  %v3315_v9 = vsub.f32 %v3249_v32, %v1341_v8  ;;  %v1170_v32 = vrot.slane %v1139_v15, 1  ;;  %v1186_v29 = vrot.slane %v1145_v19, 3 }
  0xd7   : > { %v3288_v40 = vrot.slane %v1309_v38, 6  ;;  %v911_v41 = vadd.f32 %v3268_v43, %v910_v39  ;;  %v1180_v25 = vsel %vm957_vm6, %v1178_v23, %v1179_v24  ;;  %v1187_v30 = vrot.slane %v1148_v26, 3 }
  0xd8   : > { %v1343_v10 = vmul.f32 %v3315_v9, %v3315_v9  ;;  %v1172_v22 = vsel %vm948_vm5, %v1170_v32, %v1171_v18  ;;  %v1151_v31 = vadd.f32 %v3323_v14, %v1150_v6  ;;  %v1176_v33 = vmax.f32 %v1139_v15, %v1171_v18 }
  0xd9   : > { %v3293_v42 = vsel %vm992_vm8, %v3288_v40, %v1321_v36  ;;  %v985_v46 = vrot.slane %v911_v41, 5  ;;  %v993_v53 = vrot.slane %v911_v41, 6  ;;  %v1175_v28 = vmax.f32 %v1136_v21, %v1172_v22 }
  0xda   : > { %v1411_v47 = vsel %vm1410_vm9, %v3293_v42, 0.0  ;;  %v1344_v12 = vsel %vm1330_vm4, %v1343_v10, 0.0  ;;  %v1188_v36 = vsel %vm966_vm7, %v1186_v29, %v1187_v30  ;;  %v1194_v1 = vrot.slane %v1148_v26, 4 }
  0xdb   : > { %1412 = vadd.xlane.f32.xlu2 %v1411_v47  ;;  %v986_v48 = vsel %vm983_vm10, %v984_v45, %v985_v46  ;;  %v3298_v49 = vmax.f32 %v981_v35, %v985_v46  ;;  %v1153_v13 = vpop.f32.mrf.mxu1  ;;  %v1183_v34 = vmax.f32 %v1175_v28, %v1180_v25  ;;  %v1184_v41 = vmax.f32 %v1176_v33, %v1179_v24 }
  0xdc   : > { %v989_v50 = vmax.f32 %v980_v37, %v986_v48  ;;  %v1195_v37 = vrot.slane %v1151_v31, 4  ;;  %v1154_v38 = vadd.f32 %v3323_v14, %v1153_v13  ;;  %v1202_v47 = vrot.slane %v1151_v31, 5 }
  0xdd   : > { %v1191_v44 = vmax.f32 %v1183_v34, %v1188_v36 }
  0xde   : > { %v913_v51 = vpop.f32.mrf.mxu0  ;;  %v1196_v46 = vsel %vm871_vm0, %v1194_v1, %v1195_v37  ;;  %v1203_v48 = vrot.slane %v1154_v38, 5  ;;  %v1210_v60 = vrot.slane %v1154_v38, 6 }
  0xdf   : > { %v3301_v52 = vadd.f32 %v3268_v43, %v913_v51  ;;  %v1192_v51 = vmax.f32 %v1184_v41, %v1187_v30 }
  0xe0   : > { %v1204_v59 = vsel %vm983_vm10, %v1202_v47, %v1203_v48 }
  0xe1   : > { %v994_v54 = vrot.slane %v3301_v52, 6  ;;  %v1200_v6 = vmax.f32 %v1192_v51, %v1195_v37 }
  0xe3   : > { %v995_v56 = vsel %vm992_vm8, %v993_v53, %v994_v54  ;;  %1345 = vadd.xlane.f32.xlu2 %v1344_v12  ;;  %v1156_v20 = vpop.f32.mrf.mxu1  ;;  %v1199_v53 = vmax.f32 %v1191_v44, %v1196_v46  ;;  %v999_v8 = vmax.f32 %v3298_v49, %v994_v54 }
  0xe4   : > { %v3307_v57 = vmax.f32 %v989_v50, %v995_v56  ;;  %v1157_v50 = vadd.f32 %v3323_v14, %v1156_v20  ;;  %v1208_v20 = vmax.f32 %v1200_v6, %v1203_v48 }
  0xe5   : > { %v1207_v10 = vmax.f32 %v1199_v53, %v1204_v59 }
  0xe6   : > { %v916_v58 = vpop.f32.mrf.mxu0  ;;  %v1211_v0 = vrot.slane %v1157_v50, 6  ;;  %v1218_v15 = vrot.slane %v1157_v50, 7 }
  0xe7   : > { %v917_v45 = vadd.f32 %v3268_v43, %v916_v58  ;;  %v1002_v58 = vrot.slane %v3301_v52, 7 }
  0xe9   : > { %v1003_v55 = vrot.slane %v917_v45, 7 }
  0xeb   : > { %v1159_v35 = vpop.f32.mrf.mxu1  ;;  %v1008_v16 = vmax.f32 %v999_v8, %v1003_v55 }
  0xec   : > { %v1160_v61 = vadd.f32 %v3323_v14, %v1159_v35 }
  0xee   : > { %v3309_v62 = vpop.f32.mrf.mxu0  ;;  %v1219_v32 = vrot.slane %v1160_v61, 7 }
  0xef   : > { %v920_v18 = vadd.f32 %v3268_v43, %v3309_v62 }
  0xf0   : > { %v1220_v62 = vsel %vm1001_vm12, %v1218_v15, %v1219_v32 }
  0xf3   : > { %v1162_v2 = vpop.f32.mrf.mxu1 }
  0xf6   : > { %v922_v4 = vpop.f32.mrf.mxu0 }
  0xf7   : > { %v923_v3 = vadd.f32 %v3268_v43, %v922_v4  ;;  %v1212_v4 = vsel %vm992_vm8, %v1210_v60, %v1211_v0 }
  0xf9   : > { %v1010_v54 = vmax.f32 %v1008_v16, %v923_v3 }
  0xfb   : > { %v1165_v35 = vpop.f32.mrf.mxu1 }
  0xfc   : > { %v1166_v51 = vadd.f32 %v3323_v14, %v1165_v35 }
  0xfe   : > { %v925_v11 = vpop.f32.mrf.mxu0 }
  0xff   : > { %v926_v56 = vadd.f32 %v3268_v43, %v925_v11  ;;  %v1004_v11 = vsel %vm1001_vm12, %v1002_v58, %v1003_v55 }
 0x100   : > { %v1007_v49 = vmax.f32 %v3307_v57, %v1004_v11  ;;  %v1216_v57 = vmax.f32 %v1208_v20, %v1211_v0  ;;  %v1370_v20 = vld [vmem:[%s3778_s12 + $0x10] sm:$0xff] }
 0x101   : > { %v1014_v12 = vrot.slane %v926_v56, 1  ;;  %v1021_v22 = vrot.slane %v926_v56, 2 }
 0x102   : > { %v1009_v26 = vmax.f32 %v1007_v49, %v920_v18  ;;  %v1224_v50 = vmax.f32 %v1216_v57, %v1219_v32  ;;  %v1368_v57 = vld [vmem:[%s3778_s12] sm:$0xff] }
 0x103   : > { %v1019_v28 = vmax.f32 %v1010_v54, %v1014_v12  ;;  %v1369_v54 = vld [vmem:[%s3778_s12 + $0x8] sm:$0xff] }
 0x106   : > { %v928_v17 = vpop.f32.mrf.mxu0 }
 0x107   : > { %v929_v5 = vadd.f32 %v3268_v43, %v928_v17  ;;  %v1013_v17 = vrot.slane %v923_v3, 1  ;;  %v1226_v3 = vmax.f32 %v1224_v50, %v1166_v51 }
 0x109   : > { %v1022_v19 = vrot.slane %v929_v5, 2  ;;  %v1015_v21 = vsel %vm948_vm5, %v1013_v17, %v1014_v12  ;;  %v1029_v30 = vrot.slane %v929_v5, 3  ;;  %v1314_v15 = vrot.slane %v1226_v3, 7  ;;  %v1569_v3 = vld [vmem:[%s3786_s20] sm:$0xff] }
 0x10a   : > { %v1018_v34 = vmax.f32 %v1009_v26, %v1015_v21 }
 0x10b   : > { %v1023_v29 = vsel %vm957_vm6, %v1021_v22, %v1022_v19  ;;  %v1027_v36 = vmax.f32 %v1019_v28, %v1022_v19 }
 0x10c   : > { %v1026_v44 = vmax.f32 %v1018_v34, %v1023_v29 }
 0x10e   : > { %v931_v27 = vpop.f32.mrf.mxu0 }
 0x10f   : > { %v932_v13 = vadd.f32 %v3268_v43, %v931_v27  ;;  %v1215_v27 = vmax.f32 %v1207_v10, %v1212_v4 }
 0x111   : > { %v1030_v23 = vrot.slane %v932_v13, 3  ;;  %v1037_v37 = vrot.slane %v932_v13, 4  ;;  %v1223_v41 = vmax.f32 %v1215_v27, %v1220_v62 }
 0x113   : > { %v1031_v1 = vsel %vm966_vm7, %v1029_v30, %v1030_v23  ;;  %v1035_v45 = vmax.f32 %v1027_v36, %v1030_v23  ;;  %v2858_v30 = vld [vmem:[%s3776_s10] ss:$0 sm:$0xff] }
 0x114   : > { %v1034_v53 = vmax.f32 %v1026_v44, %v1031_v1 }
 0x116   : > { %v934_v39 = vpop.f32.mrf.mxu0 }
 0x117   : > { %v935_v52 = vadd.f32 %v3268_v43, %v934_v39  ;;  %v1163_v39 = vadd.f32 %v3323_v14, %v1162_v2 }
 0x119   : > { %v1038_v31 = vrot.slane %v935_v52, 4  ;;  %v1045_v47 = vrot.slane %v935_v52, 5  ;;  %v1371_v52 = vld [vmem:[%s3778_s12 + $0x18] sm:$0xff] }
 0x11a   : > { %1391 = vmatpush.msra.mxu3 %v1371_v52 }
 0x11b   : > { %v1039_v46 = vsel %vm871_vm0, %v1037_v37, %v1038_v31  ;;  %v1043_v55 = vmax.f32 %v1035_v45, %v1038_v31 }
 0x11c   : > { %v1042_v60 = vmax.f32 %v1034_v53, %v1039_v46  ;;  %1392 = vmatpush.msra.mxu3 %v1370_v20 }
 0x11e   : > { %v937_v63 = vpop.f32.mrf.mxu0  ;;  %1393 = vmatpush.msra.mxu3 %v1369_v54 }
 0x11f   : > { %v938_v24 = vadd.f32 %v3268_v43, %v937_v63  ;;  %v1225_v63 = vmax.f32 %v1223_v41, %v1163_v39 }
 0x120   : > { %1394 = vmatpush.msra.mxu3 %v1368_v57  ;;  %v2864_v57 = vld [vmem:[%s3785_s19] ss:$0 sm:$0xff] }
 0x121   : > { %v1046_v38 = vrot.slane %v938_v24, 5  ;;  %v1053_v59 = vrot.slane %v938_v24, 6  ;;  %v1313_v14 = vrot.slane %v1225_v63, 7  ;;  %v1571_v63 = vld [vmem:[%s3786_s20 + $0x10] sm:$0xff] }
 0x123   : > { %v1047_v56 = vsel %vm983_vm10, %v1045_v47, %v1046_v38  ;;  %v1051_v58 = vmax.f32 %v1043_v55, %v1046_v38  ;;  %v1315_v4 = vsel %vm1001_vm12, %v1313_v14, %v1314_v15 }
 0x124   : > { %v1050_v5 = vmax.f32 %v1042_v60, %v1047_v56  ;;  %v1326_v17 = vsel %vm992_vm8, %v1315_v4, %v3288_v40  ;;  %v1572_v60 = vld [vmem:[%s3786_s20 + $0x18] sm:$0xff] }
 0x125   : > { %v1407_v19 = vsel %vm1330_vm4, %v1326_v17, 0.0  ;;  %1601 = vmatpush.msrb.mxu2 %v1572_v60 }
 0x126   : > { %v940_v25 = vpop.f32.mrf.mxu0 }
 0x127   : > { %v941_v33 = vadd.f32 %v3268_v43, %v940_v25  ;;  %1602 = vmatpush.msrb.mxu2 %v1571_v63 }
 0x129   : > { %v1054_v48 = vrot.slane %v941_v33, 6  ;;  %v1061_v8 = vrot.slane %v941_v33, 7  ;;  %v2859_v33 = vld [vmem:[%s3777_s11] ss:$0 sm:$0xff] }
 0x12b   : > { %v1055_v2 = vsel %vm992_vm8, %v1053_v59, %v1054_v48  ;;  %v1059_v6 = vmax.f32 %v1051_v58, %v1054_v48  ;;  %v1507_v59 = vld [vmem:[%s3782_s16 + $0x18] sm:$0xff]  ;;  %v1505_v58 = vld [vmem:[%s3782_s16 + $0x8] sm:$0xff] }
 0x12c   : > { %v1058_v11 = vmax.f32 %v1050_v5, %v1055_v2  ;;  %1536 = vmatpush.msrb.mxu3 %v1507_v59  ;;  %v1504_v2 = vld [vmem:[%s3782_s16] sm:$0xff] }
 0x12e   : > { %v943_v61 = vpop.f32.mrf.mxu0 }
 0x12f   : > { %v944_v0 = vadd.f32 %v3268_v43, %v943_v61  ;;  %v1506_v61 = vld [vmem:[%s3782_s16 + $0x10] sm:$0xff] }
 0x130   : > { %1537 = vmatpush.msrb.mxu3 %v1506_v61 }
 0x131   : > { %v1062_v10 = vrot.slane %v944_v0, 7  ;;  %v1570_v0 = vld [vmem:[%s3786_s20 + $0x8] sm:$0xff] }
 0x132   : > { %1538 = vmatpush.msrb.mxu3 %v1505_v58  ;;  %1603 = vmatpush.msrb.mxu2 %v1570_v0 }
 0x133   : > { %v1067_v12 = vmax.f32 %v1059_v6, %v1062_v10  ;;  %v1063_v13 = vsel %vm1001_vm12, %v1061_v8, %v1062_v10 }
 0x134   : > { %v1066_v16 = vmax.f32 %v1058_v11, %v1063_v13  ;;  %1539 = vmatpush.msrb.mxu3 %v1504_v2  ;;  %1604 = vmatpush.msrb.mxu2 %v1569_v3 }
 0x135   : > { %v1325_v32 = vsel %vm1001_vm12, %v1067_v12, %v1313_v14 }
 0x136   : > { %v1404_v18 = vsel %vm1330_vm4, %v1325_v32, 0.0  ;;  %v1401_v43 = vsel %vm1330_vm4, %v1066_v16, 0.0 }
 0x137   : > { %1405 = vadd.xlane.f32.xlu1 %v1404_v18  ;;  %1402 = vadd.xlane.f32.xlu0 %v1401_v43 }
 0x13f   : > { %1408 = vadd.xlane.f32.xlu1 %v1407_v19 }
 0x14e   : > { %v1413_v49 = vpop.xlane.xlu2 %1412 }
 0x14f   : > { %v1417_v37 = vmul.f32 %v1413_v49, %v3311_v7 }
 0x151   : > { %v3408_v45 = vsub.f32 %v3293_v42, %v1417_v37 }
 0x153   : > { %v1425_v53 = vmul.f32 %v3408_v45, %v3408_v45 }
 0x155   : > { %v1435_v56 = vsel %vm1410_vm9, %v1425_v53, 0.0 }
 0x156   : > { %v1346_v40 = vpop.xlane.xlu2 %1345 }
 0x157   : > { %v1347_v21 = vmul.f32 %v1346_v40, %v3311_v7 }
 0x159   : > { %v1348_v22 = vadd.f32 1e-05, %v1347_v21 }
 0x15b   : > { %2870 = vrsqrt.f32 %v1348_v22  ;;  %vm1355_vm13 = vweird.f32 %v1348_v22 }
 0x161   : > { %v2871_v23 = vpop.eup %2870 }
 0x162   : > { %v1350_v24 = vmul.f32 %v2871_v23, %v1348_v22  ;;  %vm1356_vm14 = vweird.f32 %v2871_v23 }
 0x163   : > { %vm1357_vm15 = vmor %vm1355_vm13, %vm1356_vm14 }
 0x164   : > { %v1351_v26 = vmul.f32 %v2871_v23, %v1350_v24 }
 0x166   : > { %v1352_v27 = vmul.f32 0.5, %v1351_v26 }
 0x168   : > { %v1353_v62 = vsub.f32 1.5, %v1352_v27 }
 0x16a   : > { %v1354_v28 = vmul.f32 %v2871_v23, %v1353_v62 }
 0x16c   : > { %v1358_v25 = vsel %vm1357_vm15, %v2871_v23, %v1354_v28  ;;  %v2861_v28 = vld [vmem:[%s3780_s14] ss:$0 sm:$0xff] }
 0x16d   : > { %v1359_v29 = vmul.f32 %v1358_v25, %v3315_v9  ;;  %v2863_v25 = vld [vmem:[%s3784_s18] ss:$0 sm:$0xff] }
 0x16f   : > { %v1363_v31 = vmul.f32 %v2858_v30, %v1359_v29 }
 0x171   : > { %v1367_v34 = vadd.f32 %v2859_v33, %v1363_v31  ;;  %v2862_v33 = vld [vmem:[%s3781_s15] ss:$0 sm:$0xff] }
 0x173   : > { %2685 = vmatmul.msk.f32.vlgmr.msra.gmra.mxu3 %vm1330_vm4, %v1367_v34 }
 0x1aa   : > { %v1406_v35 = vpop.xlane.xlu1 %1405  ;;  %v1403_v36 = vpop.xlane.xlu0 %1402 }
 0x1ab   : > { %v1415_v9 = vmul.f32 %v1406_v35, %v3311_v7  ;;  %v1414_v1 = vmul.f32 %v1403_v36, %v3311_v7 }
 0x1ad   : > { %v3399_v38 = vsub.f32 %v1325_v32, %v1415_v9  ;;  %v3401_v39 = vsub.f32 %v1066_v16, %v1414_v1 }
 0x1af   : > { %v1423_v41 = vmul.f32 %v3399_v38, %v3399_v38  ;;  %v1422_v44 = vmul.f32 %v3401_v39, %v3401_v39 }
 0x1b1   : > { %v1429_v46 = vsel %vm1330_vm4, %v1423_v41, 0.0  ;;  %v1426_v47 = vsel %vm1330_vm4, %v1422_v44, 0.0 }
 0x1b2   : > { %1430 = vadd.xlane.f32.xlu1 %v1429_v46  ;;  %v1409_v48 = vpop.xlane.xlu1 %1408  ;;  %1427 = vadd.xlane.f32.xlu0 %v1426_v47 }
 0x1b3   : > { %v1416_v50 = vmul.f32 %v1409_v48, %v3311_v7 }
 0x1b5   : > { %v3413_v51 = vsub.f32 %v1326_v17, %v1416_v50 }
 0x1b7   : > { %v1424_v55 = vmul.f32 %v3413_v51, %v3413_v51 }
 0x1b9   : > { %v1432_v42 = vsel %vm1330_vm4, %v1424_v55, 0.0 }
 0x1ba   : > { %1433 = vadd.xlane.f32.xlu2 %v1432_v42  ;;  %1436 = vadd.xlane.f32.xlu0 %v1435_v56 }
 0x225   : > { %v1431_v5 = vpop.xlane.xlu1 %1430  ;;  %v1428_v6 = vpop.xlane.xlu0 %1427 }
 0x226   : > { %v1439_v8 = vmul.f32 %v1431_v5, %v3311_v7  ;;  %v1438_v10 = vmul.f32 %v1428_v6, %v3311_v7  ;;  %v1396_v6 = vpop.f32.mrf.mxu3 }
 0x228   : > { %v1443_v11 = vadd.f32 1e-05, %v1439_v8  ;;  %v1442_v14 = vadd.f32 1e-05, %v1438_v10 }
 0x22a   : > { %2872 = vrsqrt.f32 %v1443_v11  ;;  %vm1452_vm3 = vweird.f32 %v1442_v14  ;;  %vm1462_vm7 = vweird.f32 %v1443_v11 }
 0x22b   : > { %2874 = vrsqrt.f32 %v1442_v14 }
 0x22d   : > { %v1434_v12 = vpop.xlane.xlu2 %1433  ;;  %v1437_v13 = vpop.xlane.xlu0 %1436 }
 0x22e   : > { %v1440_v15 = vmul.f32 %v1434_v12, %v3311_v7  ;;  %v1441_v16 = vmul.f32 %v1437_v13, %v3311_v7  ;;  %v2866_v13 = vld [vmem:[%s3787_s21] ss:$0 sm:$0xff] }
 0x230   : > { %v2873_v32 = vpop.eup %2872  ;;  %v1444_v18 = vadd.f32 1e-05, %v1440_v15  ;;  %v1445_v43 = vadd.f32 1e-05, %v1441_v16 }
 0x231   : > { %v2875_v4 = vpop.eup %2874  ;;  %v1457_v17 = vmul.f32 %v2873_v32, %v1443_v11  ;;  %vm1463_vm5 = vweird.f32 %v2873_v32  ;;  %v2865_v11 = vld [vmem:[%s3783_s17] ss:$0 sm:$0xff] }
 0x232   : > { %v1447_v19 = vmul.f32 %v2875_v4, %v1442_v14  ;;  %2876 = vrsqrt.f32 %v1444_v18  ;;  %vm1453_vm2 = vweird.f32 %v2875_v4  ;;  %vm1464_vm8 = vmor %vm1462_vm7, %vm1463_vm5  ;;  %vm1472_vm11 = vweird.f32 %v1444_v18 }
 0x233   : > { %v1458_v52 = vmul.f32 %v2873_v32, %v1457_v17  ;;  %2878 = vrsqrt.f32 %v1445_v43  ;;  %vm1454_vm6 = vmor %vm1452_vm3, %vm1453_vm2  ;;  %vm1482_vm14 = vweird.f32 %v1445_v43  ;;  %vm1663_vm2 = vcmask 220160  }
 0x234   : > { %v1448_v20 = vmul.f32 %v2875_v4, %v1447_v19 }
 0x235   : > { %v1459_v49 = vmul.f32 0.5, %v1458_v52 }
 0x236   : > { %v1449_v54 = vmul.f32 0.5, %v1448_v20  ;;  %v2860_v20 = vld [vmem:[%s3779_s13] ss:$0 sm:$0xff] }
 0x237   : > { %v1460_v40 = vsub.f32 1.5, %v1459_v49  ;;  %v1397_v49 = vadd.f32 %v2860_v20, %v1396_v6 }
 0x238   : > { %v2877_v21 = vpop.eup %2876  ;;  %v1450_v22 = vsub.f32 1.5, %v1449_v54 }
 0x239   : > { %v2879_v23 = vpop.eup %2878  ;;  %v1467_v24 = vmul.f32 %v2877_v21, %v1444_v18  ;;  %v1461_v7 = vmul.f32 %v2873_v32, %v1460_v40  ;;  %vm1473_vm9 = vweird.f32 %v2877_v21  ;;  %v3506_v54 = vmul.f32 0.5, %v1397_v49 }
 0x23a   : > { %v1451_v26 = vmul.f32 %v2875_v4, %v1450_v22  ;;  %v1477_v27 = vmul.f32 %v2879_v23, %v1445_v43  ;;  %vm1474_vm12 = vmor %vm1472_vm11, %vm1473_vm9  ;;  %vm1483_vm13 = vweird.f32 %v2879_v23 }
 0x23b   : > { %v1468_v62 = vmul.f32 %v2877_v21, %v1467_v24  ;;  %v1465_v34 = vsel %vm1464_vm8, %v2873_v32, %v1461_v7  ;;  %vm1484_vm15 = vmor %vm1482_vm14, %vm1483_vm13 }
 0x23c   : > { %v1455_v29 = vsel %vm1454_vm6, %v2875_v4, %v1451_v26  ;;  %v1478_v35 = vmul.f32 %v2879_v23, %v1477_v27  ;;  %v1487_v44 = vmul.f32 %v1465_v34, %v3399_v38 }
 0x23d   : > { %v1486_v30 = vmul.f32 %v1455_v29, %v3401_v39  ;;  %v1469_v31 = vmul.f32 0.5, %v1468_v62 }
 0x23e   : > { %v1479_v39 = vmul.f32 0.5, %v1478_v35  ;;  %v1494_v47 = vmul.f32 %v2861_v28, %v1487_v44  ;;  %v1559_v48 = vmul.f32 %v2863_v25, %v1487_v44 }
 0x23f   : > { %v1470_v36 = vsub.f32 1.5, %v1469_v31  ;;  %v1493_v9 = vmul.f32 %v2861_v28, %v1486_v30  ;;  %v1558_v1 = vmul.f32 %v2863_v25, %v1486_v30 }
 0x240   : > { %v1480_v53 = vsub.f32 1.5, %v1479_v39  ;;  %v1501_v55 = vadd.f32 %v2862_v33, %v1494_v47  ;;  %v1566_v42 = vadd.f32 %v2864_v57, %v1559_v48 }
 0x241   : > { %v1500_v37 = vadd.f32 %v2862_v33, %v1493_v9  ;;  %v1565_v41 = vadd.f32 %v2864_v57, %v1558_v1  ;;  %v1471_v46 = vmul.f32 %v2877_v21, %v1470_v36 }
 0x242   : > { %v1481_v59 = vmul.f32 %v2879_v23, %v1480_v53  ;;  %v1619_v53 = vld [vmem:[%s3788_s22] sm:$0xff] }
 0x243   : > { %2686 = vmatmul.msk.f32.vlgmr.msrb.gmra.mxu3 %vm1330_vm4, %v1500_v37  ;;  %2690 = vmatmul.msk.f32.vlgmr.msrb.gmra.mxu2 %vm1330_vm4, %v1565_v41  ;;  %v1475_v50 = vsel %vm1474_vm12, %v2877_v21, %v1471_v46  ;;  %v1818_v20 = vrot.slane %v1619_v53, 4 }
 0x244   : > { %v1488_v56 = vmul.f32 %v1475_v50, %v3413_v51  ;;  %v1485_v61 = vsel %vm1484_vm15, %v2879_v23, %v1481_v59 }
 0x245   : > { %v1489_v0 = vmul.f32 %v1485_v61, %v3408_v45 }
 0x246   : > { %v1495_v38 = vmul.f32 %v2861_v28, %v1488_v56  ;;  %v1560_v60 = vmul.f32 %v2863_v25, %v1488_v56 }
 0x247   : > { %v1496_v51 = vmul.f32 %v2861_v28, %v1489_v0  ;;  %v1561_v2 = vmul.f32 %v2863_v25, %v1489_v0 }
 0x248   : > { %v1502_v63 = vadd.f32 %v2862_v33, %v1495_v38  ;;  %v1567_v58 = vadd.f32 %v2864_v57, %v1560_v60 }
 0x249   : > { %v1503_v3 = vadd.f32 %v2862_v33, %v1496_v51  ;;  %v1568_v5 = vadd.f32 %v2864_v57, %v1561_v2 }
 0x24b   : > { %2687 = vmatmul.msk.f32.gmra.mxu3 %vm1330_vm4, %v1501_v55  ;;  %2691 = vmatmul.msk.f32.gmra.mxu2 %vm1330_vm4, %v1566_v42 }
 0x253   : > { %2688 = vmatmul.msk.f32.gmra.mxu3 %vm1330_vm4, %v1502_v63  ;;  %2692 = vmatmul.msk.f32.gmra.mxu2 %vm1330_vm4, %v1567_v58 }
 0x25b   : > { %2689 = vmatmul.msk.f32.gmra.mxu3 %vm1330_vm4, %v1503_v3  ;;  %2693 = vmatmul.msk.f32.gmra.mxu2 %vm1330_vm4, %v1568_v5 }
 0x2c6   : > { %v1541_v8 = vpop.f32.mrf.mxu3  ;;  %v1606_v10 = vpop.f32.mrf.mxu2 }
 0x2c7   : > { %v3489_v19 = vadd.f32 %v2865_v11, %v1541_v8  ;;  %v3528_v22 = vadd.f32 %v2866_v13, %v1606_v10 }
 0x2ce   : > { %v1544_v45 = vpop.f32.mrf.mxu3  ;;  %v1609_v14 = vpop.f32.mrf.mxu2 }
 0x2cf   : > { %v3476_v12 = vadd.f32 %v2865_v11, %v1544_v45  ;;  %v1610_v32 = vadd.f32 %v2866_v13, %v1609_v14 }
 0x2d1   : > { %1849 = vrot.lane.b32.xlu0 %v3476_v12, %s2978_s0 }
 0x2d6   : > { %v1547_v15 = vpop.f32.mrf.mxu3  ;;  %v1612_v16 = vpop.f32.mrf.mxu2 }
 0x2d7   : > { %v3483_v18 = vadd.f32 %v2865_v11, %v1547_v15  ;;  %v1613_v43 = vadd.f32 %v2866_v13, %v1612_v16 }
 0x2d9   : > { %1851 = vrot.lane.b32.xlu2 %v3483_v18, %s2978_s0  ;;  %v3487_v4 = vpack.i.bf16 %v1610_v32, %v1613_v43 }
 0x2de   : > { %v1550_v17 = vpop.f32.mrf.mxu3  ;;  %v1615_v40 = vpop.f32.mrf.mxu2 }
 0x2df   : > { %v3491_v52 = vadd.f32 %v2865_v11, %v1550_v17  ;;  %v3516_v21 = vadd.f32 %v2866_v13, %v1615_v40 }
 0x2e1   : > { %1847 = vrot.lane.b32.xlu2 %v3489_v19, %s2978_s0  ;;  %1736 = vrot.lane.b32.xlu0 %v3491_v52, %s2979_s27 }
 0x2e2   : > { %1853 = vrot.lane.b32.xlu1 %v3491_v52, %s2978_s0  ;;  %2694 = vmatpush.xpose.msk.msra.mxu3 %vm816_vm1, %v3491_v52 }
 0x2e6   : > { %2695 = vmatpush.xpose.msk.msra.mxu3 %vm816_vm1, %v3483_v18 }
 0x2e9   : > { %1734 = vrot.lane.b32.xlu2 %v3483_v18, %s2979_s27  ;;  %1730 = vrot.lane.b32.xlu0 %v3489_v19, %s2979_s27 }
 0x2ea   : > { %1845 = vrot.lane.b32.xlu1 %v3506_v54, %s2978_s0  ;;  %2696 = vmatpush.xpose.msk.msra.mxu3 %vm816_vm1, %v3476_v12 }
 0x2ee   : > { %2697 = vmatpush.xpose.msk.msra.mxu3 %vm816_vm1, %v3489_v19 }
 0x2f1   : > { %2698 = vmatmul.msk.f32.vlgmr.msra.gmra.mxu3 %vm816_vm1, %v3506_v54  ;;  %1728 = vrot.lane.b32.xlu2 %v3506_v54, %s2979_s27 }
 0x2f2   : > { %2699 = vmatpush.msk.msrb.mxu3 %vm983_vm10, %v3516_v21  ;;  %1732 = vrot.lane.b32.xlu1 %v3476_v12, %s2979_s27 }
 0x2f4   : > { %1694 = vmatpush.msrb.mxu3 %v1613_v43 }
 0x2f6   : > { %1695 = vmatpush.msrb.mxu3 %v1610_v32 }
 0x2f8   : > { %1696 = vmatpush.msrb.mxu3 %v3528_v22 }
 0x2fa   : > { %2701 = vmatpush.msk.msra.mxu3 %vm871_vm0, %v1619_v53 }
 0x333   : > { %v1852_v23 = vpop.permute.xlu2 %1851 }
 0x33b   : > { %v1848_v7 = vpop.permute.xlu2 %1847 }
 0x343   : > { %v1850_v24 = vpop.permute.xlu0 %1849  ;;  %v1735_v62 = vpop.permute.xlu2 %1734 }
 0x34b   : > { %v1729_v30 = vpop.permute.xlu2 %1728 }
 0x353   : > { %v1737_v26 = vpop.permute.xlu0 %1736 }
 0x354   : > { %v1854_v27 = vpop.permute.xlu1 %1853  ;;  %2703 = vmatpush.xpose.msk.msra.mxu2 %vm816_vm1, %v1737_v26 }
 0x355   : > { %2712 = vmatpush.xpose.msk.msrb.mxu1 %vm816_vm1, %v1854_v27 }
 0x358   : > { %2704 = vmatpush.xpose.msk.msra.mxu2 %vm816_vm1, %v1735_v62  ;;  %v1620_v62 = vld [vmem:[%s3788_s22 + $0x8] sm:$0xff] }
 0x359   : > { %2713 = vmatpush.xpose.msk.msrb.mxu1 %vm816_vm1, %v1852_v23 }
 0x35b   : > { %v1731_v29 = vpop.permute.xlu0 %1730 }
 0x35c   : > { %v1846_v28 = vpop.permute.xlu1 %1845 }
 0x35d   : > { %2714 = vmatpush.xpose.msk.msrb.mxu1 %vm816_vm1, %v1850_v24 }
 0x361   : > { %2715 = vmatpush.xpose.msk.msrb.mxu1 %vm816_vm1, %v1848_v7 }
 0x364   : > { %v1733_v25 = vpop.permute.xlu1 %1732  ;;  %2716 = vmatmul.msk.f32.vlgmr.msrb.gmra.mxu1 %vm816_vm1, %v1846_v28  ;;  %v2046_v28 = vrot.slane %v1620_v62, 4 }
 0x365   : > { %2705 = vmatpush.xpose.msk.msra.mxu2 %vm816_vm1, %v1733_v25 }
 0x366   : > { %2728 = vmatpush.msk.msra.mxu1 %vm871_vm0, %v2046_v28 }
 0x369   : > { %2706 = vmatpush.xpose.msk.msra.mxu2 %vm816_vm1, %v1731_v29 }
 0x36c   : > { %2707 = vmatmul.msk.f32.vlgmr.msra.gmra.mxu2 %vm816_vm1, %v1729_v30 }
 0x374   : > { %v1660_v31 = vpop.f32.mrf.mxu3 }
 0x375   : > { %v1664_v33 = vsel %vm1663_vm2, %v1660_v31, -inf }
 0x376   : > { %1665 = vmax.xlane.f32.xlu1 %v1664_v33 }
 0x38f   : > { %2821 = vrot.lane.b32.xlu1 %v3487_v4, %s2978_s0 }
 0x3e1   : > { %v1882_v57 = vpop.f32.mrf.mxu1 }
 0x3e2   : > { %v1885_v34 = vsel %vm1663_vm2, %v1882_v57, -inf }
 0x3e3   : > { %1886 = vmax.xlane.f32.xlu0 %v1885_v34 }
 0x3e9   : > { %v1666_v35 = vpop.xlane.xlu1 %1665 }
 0x3ea   : > { %v1667_v36 = vsub.f32 %v1660_v31, %v1666_v35 }
 0x3ec   : > { %v1668_v9 = vmul.f32 1.442695, %v1667_v36 }
 0x3ee   : > { %2880 = vpow2.f32 %v1668_v9 }
 0x3ef   : > { %v1765_v41 = vpop.f32.mrf.mxu2 }
 0x3f0   : > { %v1768_v44 = vsel %vm1663_vm2, %v1765_v41, -inf }
 0x3f4   : > { %v2881_v1 = vpop.eup %2880 }
 0x3f5   : > { %v1670_v37 = vsel %vm1663_vm2, %v2881_v1, 0.0 }
 0x3f6   : > { %1671 = vadd.xlane.f32.xlu2 %v1670_v37 }
 0x3f7   : > { %1902 = vrot.lane.b32.xlu0 %v3516_v21, %s2978_s0 }
 0x3ff   : > { %1965 = vrot.lane.b32.xlu0 %v3483_v18, %s2980_s24 }
 0x401   : > { %v2822_v55 = vpop.permute.xlu1 %2821 }
 0x402   : > { %v2823_v59 = vunpack.i.l.bf16 %v2822_v55  ;;  %v2824_v38 = vunpack.i.h.bf16 %v2822_v55  ;;  %v2867_v55 = vld [vmem:[%s3789_s23] ss:$0 sm:$0xff] }
 0x407   : > { %1963 = vrot.lane.b32.xlu0 %v3476_v12, %s2980_s24 }
 0x40e   : > { %1967 = vrot.lane.b32.xlu2 %v3491_v52, %s2980_s24 }
 0x416   : > { %1896 = vrot.lane.b32.xlu2 %v3528_v22, %s2978_s0 }
 0x41e   : > { %1959 = vrot.lane.b32.xlu2 %v3506_v54, %s2980_s24 }
 0x426   : > { %1788 = vrot.lane.b32.xlu2 %v3516_v21, %s2979_s27 }
 0x42e   : > { %2826 = vrot.lane.b32.xlu2 %v3487_v4, %s2979_s27 }
 0x431   : > { %1769 = vmax.xlane.f32.xlu0 %v1768_v44 }
 0x436   : > { %1782 = vrot.lane.b32.xlu2 %v3528_v22, %s2979_s27 }
 0x445   : > { %2081 = vrot.lane.b32.xlu0 %v3491_v52, %s2981_s28 }
 0x44d   : > { %2079 = vrot.lane.b32.xlu0 %v3483_v18, %s2981_s28 }
 0x456   : > { %v1887_v46 = vpop.xlane.xlu0 %1886 }
 0x457   : > { %v1888_v39 = vsub.f32 %v1882_v57, %v1887_v46 }
 0x459   : > { %v1889_v47 = vmul.f32 1.442695, %v1888_v39 }
 0x45b   : > { %2882 = vpow2.f32 %v1889_v47 }
 0x461   : > { %v2883_v48 = vpop.eup %2882 }
 0x462   : > { %v1891_v50 = vsel %vm1663_vm2, %v2883_v48, 0.0 }
 0x463   : > { %1892 = vadd.xlane.f32.xlu1 %v1891_v50 }
 0x469   : > { %v1672_v42 = vpop.xlane.xlu2 %1671  ;;  %v1903_v56 = vpop.permute.xlu0 %1902 }
 0x46a   : > { %2884 = vrcp.f32 %v1672_v42  ;;  %2717 = vmatpush.msk.msrb.mxu2 %vm983_vm10, %v1903_v56  ;;  %v2912_v42 = vld [vmem:[%s3245_s1] sm:$0xff]  ;;  %s2983_s1 = smov 104  }
 0x46b   : > { %v1627_v56 = vadd.f32 %v2912_v42, %v2867_v55 }
 0x46c   : > { %1925 = vmatpush.msrb.mxu2 %v2823_v59 }
 0x46e   : > { %1926 = vmatpush.msrb.mxu2 %v2824_v38 }
 0x470   : > { %v2885_v60 = vpop.eup %2884 }
 0x471   : > { %v1674_v61 = vmul.f32 %v2885_v60, %v2881_v1  ;;  %v1968_v63 = vpop.permute.xlu2 %1967  ;;  %v1966_v58 = vpop.permute.xlu0 %1965 }
 0x473   : > { %2700 = vmatmul.msk.f32.vlgmr.msrb.gmra.mxu3 %vm1663_vm2, %v1674_v61 }
 0x479   : > { %v1897_v0 = vpop.permute.xlu2 %1896  ;;  %v1964_v2 = vpop.permute.xlu0 %1963 }
 0x47a   : > { %1927 = vmatpush.msrb.mxu2 %v1897_v0 }
 0x47c   : > { %2721 = vmatpush.xpose.msk.msra.mxu2 %vm816_vm1, %v1968_v63  ;;  %1961 = vrot.lane.b32.xlu1 %v3489_v19, %s2980_s24 }
 0x480   : > { %2722 = vmatpush.xpose.msk.msra.mxu2 %vm816_vm1, %v1966_v58 }
 0x481   : > { %v1960_v51 = vpop.permute.xlu2 %1959 }
 0x484   : > { %2723 = vmatpush.xpose.msk.msra.mxu2 %vm816_vm1, %v1964_v2 }
 0x489   : > { %v1789_v3 = vpop.permute.xlu2 %1788 }
 0x48a   : > { %2708 = vmatpush.msk.msrb.mxu3 %vm983_vm10, %v1789_v3 }
 0x491   : > { %v2827_v5 = vpop.permute.xlu2 %2826 }
 0x492   : > { %v2828_v6 = vunpack.i.l.bf16 %v2827_v5  ;;  %v2829_v8 = vunpack.i.h.bf16 %v2827_v5 }
 0x494   : > { %1811 = vmatpush.msrb.mxu3 %v2828_v6 }
 0x496   : > { %1812 = vmatpush.msrb.mxu3 %v2829_v8 }
 0x499   : > { %v1783_v10 = vpop.permute.xlu2 %1782 }
 0x49a   : > { %1813 = vmatpush.msrb.mxu3 %v1783_v10 }
 0x4a4   : > { %v1770_v11 = vpop.xlane.xlu0 %1769 }
 0x4a5   : > { %v1771_v45 = vsub.f32 %v1765_v41, %v1770_v11 }
 0x4a7   : > { %v1772_v14 = vmul.f32 1.442695, %v1771_v45 }
 0x4a9   : > { %2886 = vpow2.f32 %v1772_v14 }
 0x4af   : > { %v2887_v13 = vpop.eup %2886 }
 0x4b0   : > { %v1774_v15 = vsel %vm1663_vm2, %v2887_v13, 0.0 }
 0x4b1   : > { %1775 = vadd.xlane.f32.xlu1 %v1774_v15 }
 0x4b7   : > { %v2082_v36 = vpop.permute.xlu0 %2081 }
 0x4bf   : > { %v2080_v44 = vpop.permute.xlu0 %2079 }
 0x4ca   : > { %2016 = vrot.lane.b32.xlu1 %v3516_v21, %s2980_s24 }
 0x4d2   : > { %2831 = vrot.lane.b32.xlu1 %v3487_v4, %s2980_s24 }
 0x4d6   : > { %v1893_v16 = vpop.xlane.xlu1 %1892 }
 0x4d7   : > { %2888 = vrcp.f32 %v1893_v16 }
 0x4da   : > { %2077 = vrot.lane.b32.xlu1 %v3476_v12, %s2981_s28 }
 0x4dd   : > { %v2889_v32 = vpop.eup %2888 }
 0x4de   : > { %v1895_v43 = vmul.f32 %v2889_v32, %v2883_v48  ;;  %v1621_v32 = vld [vmem:[%s3788_s22 + $0x10] sm:$0xff] }
 0x4e0   : > { %2718 = vmatmul.msk.f32.vlgmr.msrb.gmra.mxu2 %vm1663_vm2, %v1895_v43  ;;  %v2274_v43 = vrot.slane %v1621_v32, 4 }
 0x4e2   : > { %2073 = vrot.lane.b32.xlu1 %v3506_v54, %s2981_s28 }
 0x4ee   : > { %v1962_v17 = vpop.permute.xlu1 %1961 }
 0x4ef   : > { %2724 = vmatpush.xpose.msk.msra.mxu2 %vm816_vm1, %v1962_v17 }
 0x4f2   : > { %2725 = vmatmul.msk.f32.vlgmr.msra.gmra.mxu2 %vm816_vm1, %v1960_v51 }
 0x4f3   : > { %2737 = vmatpush.msk.msrb.mxu2 %vm871_vm0, %v1621_v32 }
 0x4f6   : > { %v1698_v49 = vpop.f32.mrf.mxu3 }
 0x4f7   : > { %2702 = vmatmul.msk.f32.vlgmr.msra.gmra.mxu3 %vm816_vm1, %v1698_v49 }
 0x4f8   : > { %2710 = vmatpush.msk.msra.mxu3 %vm871_vm0, %v1818_v20 }
 0x524   : > { %v1776_v40 = vpop.xlane.xlu1 %1775 }
 0x525   : > { %2890 = vrcp.f32 %v1776_v40 }
 0x52b   : > { %v2891_v23 = vpop.eup %2890 }
 0x52c   : > { %v1778_v24 = vmul.f32 %v2891_v23, %v2887_v13 }
 0x52e   : > { %2709 = vmatmul.msk.f32.vlgmr.msrb.gmra.mxu3 %vm1663_vm2, %v1778_v24 }
 0x52f   : > { %2719 = vmatpush.msk.msrb.mxu3 %vm871_vm0, %v1620_v62 }
 0x53c   : > { %v2017_v25 = vpop.permute.xlu1 %2016 }
 0x544   : > { %v2832_v30 = vpop.permute.xlu1 %2831 }
 0x545   : > { %v2833_v33 = vunpack.i.l.bf16 %v2832_v30  ;;  %v2834_v57 = vunpack.i.h.bf16 %v2832_v30 }
 0x54c   : > { %v2078_v39 = vpop.permute.xlu1 %2077 }
 0x554   : > { %v2074_v51 = vpop.permute.xlu1 %2073 }
 0x563   : > { %v1929_v7 = vpop.f32.mrf.mxu2 }
 0x575   : > { %v1996_v26 = vpop.f32.mrf.mxu2 }
 0x576   : > { %v1999_v27 = vsel %vm1663_vm2, %v1996_v26, -inf }
 0x577   : > { %2000 = vmax.xlane.f32.xlu2 %v1999_v27 }
 0x57a   : > { %v1724_v29 = vpop.f32.mrf.mxu3 }
 0x57b   : > { %v1727_v59 = vadd.f32 %v1724_v29, %v1627_v56 }
 0x58f   : > { %2010 = vrot.lane.b32.xlu2 %v3528_v22, %s2980_s24  ;;  %s3834_s24 = sld [smem:[#allocation8_spill]] }
 0x595   : > { %s2767_s3 = sshll.u32 %s3834_s24, 3 }
 0x597   : > { %2130 = vrot.lane.b32.xlu2 %v3516_v21, %s2981_s28 }
 0x59f   : > { %2195 = vrot.lane.b32.xlu2 %v3491_v52, %s2982_s2 }
 0x5a7   : > { %2836 = vrot.lane.b32.xlu2 %v3487_v4, %s2981_s28 }
 0x5af   : > { %2193 = vrot.lane.b32.xlu2 %v3483_v18, %s2982_s2 }
 0x5b1   : > { %v1815_v31 = vpop.f32.mrf.mxu3 }
 0x5b2   : > { %2711 = vmatmul.msk.f32.vlgmr.msra.gmra.mxu3 %vm816_vm1, %v1815_v31 }
 0x5b3   : > { %2726 = vmatpush.msk.msra.mxu3 %vm983_vm10, %v2017_v25 }
 0x5b5   : > { %2039 = vmatpush.msra.mxu3 %v2833_v33 }
 0x5b7   : > { %2040 = vmatpush.msra.mxu3 %v2834_v57  ;;  %2191 = vrot.lane.b32.xlu2 %v3476_v12, %s2982_s2 }
 0x5ba   : > { %2720 = vmatmul.msk.f32.vlgmr.msrb.gmra.mxu3 %vm816_vm1, %v1929_v7 }
 0x5bf   : > { %2187 = vrot.lane.b32.xlu2 %v3506_v54, %s2982_s2 }
 0x5ea   : > { %v2001_v34 = vpop.xlane.xlu2 %2000 }
 0x5eb   : > { %v2002_v35 = vsub.f32 %v1996_v26, %v2001_v34 }
 0x5ed   : > { %v2003_v9 = vmul.f32 1.442695, %v2002_v35 }
 0x5ef   : > { %2892 = vpow2.f32 %v2003_v9 }
 0x5f2   : > { %v2011_v1 = vpop.permute.xlu2 %2010 }
 0x5f3   : > { %2041 = vmatpush.msra.mxu3 %v2011_v1 }
 0x5f5   : > { %2730 = vmatpush.xpose.msk.msrb.mxu3 %vm816_vm1, %v2082_v36  ;;  %v2893_v37 = vpop.eup %2892 }
 0x5f6   : > { %v2005_v41 = vsel %vm1663_vm2, %v2893_v37, 0.0 }
 0x5f7   : > { %2006 = vadd.xlane.f32.xlu0 %v2005_v41 }
 0x5f9   : > { %2731 = vmatpush.xpose.msk.msrb.mxu3 %vm816_vm1, %v2080_v44 }
 0x5fa   : > { %v2131_v46 = vpop.permute.xlu2 %2130 }
 0x5fb   : > { %2735 = vmatpush.msk.msrb.mxu1 %vm983_vm10, %v2131_v46 }
 0x5fd   : > { %2732 = vmatpush.xpose.msk.msrb.mxu3 %vm816_vm1, %v2078_v39 }
 0x602   : > { %v2196_v47 = vpop.permute.xlu2 %2195 }
 0x60a   : > { %v2837_v48 = vpop.permute.xlu2 %2836 }
 0x60b   : > { %v2838_v50 = vunpack.i.l.bf16 %v2837_v48  ;;  %2075 = vrot.lane.b32.xlu0 %v3489_v19, %s2981_s28  ;;  %v2839_v53 = vunpack.i.h.bf16 %v2837_v48 }
 0x60d   : > { %2153 = vmatpush.msrb.mxu1 %v2838_v50 }
 0x60f   : > { %2154 = vmatpush.msrb.mxu1 %v2839_v53 }
 0x612   : > { %v2194_v13 = vpop.permute.xlu2 %2193 }
 0x61a   : > { %v2192_v16 = vpop.permute.xlu2 %2191 }
 0x622   : > { %v2188_v23 = vpop.permute.xlu2 %2187 }
 0x635   : > { %v1841_v38 = vpop.f32.mrf.mxu3 }
 0x636   : > { %v3631_v60 = vadd.f32 %v1841_v38, %v1727_v59 }
 0x63d   : > { %v3636_v2 = vpop.f32.mrf.mxu3 }
 0x66a   : > { %v2007_v61 = vpop.xlane.xlu0 %2006 }
 0x66b   : > { %2894 = vrcp.f32 %v2007_v61  ;;  %v1622_v61 = vld [vmem:[%s3788_s22 + $0x18] sm:$0xff] }
 0x671   : > { %v2895_v63 = vpop.eup %2894 }
 0x672   : > { %v2009_v58 = vmul.f32 %v2895_v63, %v2893_v37  ;;  %v2502_v63 = vrot.slane %v1622_v61, 4 }
 0x674   : > { %2727 = vmatmul.msk.f32.vlgmr.msra.gmra.mxu3 %vm1663_vm2, %v2009_v58 }
 0x67d   : > { %v2076_v0 = vpop.permute.xlu0 %2075 }
 0x67e   : > { %2733 = vmatpush.xpose.msk.msrb.mxu3 %vm816_vm1, %v2076_v0 }
 0x681   : > { %2734 = vmatmul.msk.f32.vlgmr.msrb.gmra.mxu3 %vm816_vm1, %v2074_v51 }
 0x682   : > { %2746 = vmatpush.msk.msra.mxu3 %vm871_vm0, %v2274_v43 }
 0x6f7   : > { %v2043_v3 = vpop.f32.mrf.mxu3 }
 0x6f8   : > { %2729 = vmatmul.msk.f32.vlgmr.msra.gmra.mxu1 %vm816_vm1, %v2043_v3 }
 0x704   : > { %v2110_v5 = vpop.f32.mrf.mxu3 }
 0x705   : > { %v2113_v6 = vsel %vm1663_vm2, %v2110_v5, -inf }
 0x706   : > { %2114 = vmax.xlane.f32.xlu0 %v2113_v6 }
 0x71a   : > { %2124 = vrot.lane.b32.xlu0 %v3528_v22, %s2981_s28  ;;  %s771_s28 = sand.u32 1, %s2967_s26  }
 0x71b   : > { %s2645_s6 = sshll.u32 %s771_s28, 3 }
 0x775   : > { %v3669_v28 = vpop.f32.mrf.mxu1 }
 0x779   : > { %v2115_v8 = vpop.xlane.xlu0 %2114 }
 0x77a   : > { %v2116_v10 = vsub.f32 %v2110_v5, %v2115_v8 }
 0x77c   : > { %v2117_v11 = vmul.f32 1.442695, %v2116_v10 }
 0x77e   : > { %2896 = vpow2.f32 %v2117_v11 }
 0x784   : > { %v2897_v45 = vpop.eup %2896 }
 0x785   : > { %v2119_v14 = vsel %vm1663_vm2, %v2897_v45, 0.0 }
 0x786   : > { %2120 = vadd.xlane.f32.xlu1 %v2119_v14 }
 0x78c   : > { %v2125_v15 = vpop.permute.xlu0 %2124 }
 0x78d   : > { %2155 = vmatpush.msrb.mxu1 %v2125_v15 }
 0x78f   : > { %2739 = vmatpush.xpose.msk.msra.mxu1 %vm816_vm1, %v2196_v47 }
 0x793   : > { %2740 = vmatpush.xpose.msk.msra.mxu1 %vm816_vm1, %v2194_v13 }
 0x797   : > { %2741 = vmatpush.xpose.msk.msra.mxu1 %vm816_vm1, %v2192_v16 }
 0x79f   : > { %2189 = vrot.lane.b32.xlu1 %v3489_v19, %s2982_s2 }
 0x7a7   : > { %2244 = vrot.lane.b32.xlu1 %v3516_v21, %s2982_s2 }
 0x7af   : > { %2309 = vrot.lane.b32.xlu1 %v3491_v52, %s2983_s1 }
 0x7b7   : > { %2841 = vrot.lane.b32.xlu1 %v3487_v4, %s2982_s2 }
 0x7bf   : > { %2307 = vrot.lane.b32.xlu1 %v3483_v18, %s2983_s1 }
 0x7c7   : > { %2303 = vrot.lane.b32.xlu1 %v3489_v19, %s2983_s1 }
 0x7cf   : > { %2301 = vrot.lane.b32.xlu1 %v3506_v54, %s2983_s1 }
 0x7f9   : > { %v2121_v17 = vpop.xlane.xlu1 %2120 }
 0x7fa   : > { %2898 = vrcp.f32 %v2121_v17 }
 0x800   : > { %v2899_v20 = vpop.eup %2898 }
 0x801   : > { %v2123_v49 = vmul.f32 %v2899_v20, %v2897_v45 }
 0x803   : > { %2736 = vmatmul.msk.f32.vlgmr.msrb.gmra.mxu1 %vm1663_vm2, %v2123_v49 }
 0x811   : > { %v2190_v40 = vpop.permute.xlu1 %2189 }
 0x812   : > { %2742 = vmatpush.xpose.msk.msra.mxu1 %vm816_vm1, %v2190_v40 }
 0x815   : > { %2743 = vmatmul.msk.f32.vlgmr.msra.gmra.mxu1 %vm816_vm1, %v2188_v23 }
 0x816   : > { %2755 = vmatpush.msk.msrb.mxu1 %vm871_vm0, %v1622_v61 }
 0x819   : > { %v2245_v24 = vpop.permute.xlu1 %2244 }
 0x81a   : > { %2744 = vmatpush.msk.msra.mxu2 %vm983_vm10, %v2245_v24 }
 0x821   : > { %v2310_v7 = vpop.permute.xlu1 %2309 }
 0x829   : > { %v2842_v26 = vpop.permute.xlu1 %2841 }
 0x82a   : > { %v2843_v27 = vunpack.i.l.bf16 %v2842_v26  ;;  %v2844_v62 = vunpack.i.h.bf16 %v2842_v26 }
 0x82c   : > { %2267 = vmatpush.msra.mxu2 %v2843_v27  ;;  %v1958_v27 = vadd.f32 %v3636_v2, %v3631_v60 }
 0x82e   : > { %2268 = vmatpush.msra.mxu2 %v2844_v62  ;;  %v2072_v62 = vadd.f32 %v3669_v28, %v1958_v27 }
 0x831   : > { %v2308_v9 = vpop.permute.xlu1 %2307 }
 0x839   : > { %v2304_v44 = vpop.permute.xlu1 %2303 }
 0x841   : > { %v2302_v46 = vpop.permute.xlu1 %2301 }
 0x880   : > { %v2157_v25 = vpop.f32.mrf.mxu1 }
 0x881   : > { %2738 = vmatmul.msk.f32.vlgmr.msrb.gmra.mxu2 %vm816_vm1, %v2157_v25 }
 0x892   : > { %v2224_v29 = vpop.f32.mrf.mxu1 }
 0x893   : > { %v2227_v30 = vsel %vm1663_vm2, %v2224_v29, -inf }
 0x894   : > { %2228 = vmax.xlane.f32.xlu2 %v2227_v30 }
 0x8ac   : > { %2238 = vrot.lane.b32.xlu2 %v3528_v22, %s2982_s2  ;;  %s3835_s2 = sld [smem:[#allocation23_spill]] }
 0x8b2   : > { %s2541_s30 = scalar_lea.hbm %s3835_s2, %s2767_s3 }
 0x8b3   : > { %s2545_s29 = sshll.u32 %s2541_s30, 4  ;;  %s2546_s29 = int_to_ptr.hbm [resolvable:$true] %s2545_s29 }
 0x8b4   : > { %s2927_s25 = sshra.s32 %s2546_s29, 4  ;;  %s2928_s25 = int_to_ptr.hbm [resolvable:$true] %s2927_s25 }
 0x8b5   : > { %s2929_s27 = scalar_lea.hbm %s2928_s25, 8  ;;  %p2934_p0 = scmp.lt.s32.totalorder %s2928_s25, %s3835_s2 }
 0x8b6   : > { %p2930_p11 = scmp.ne.s32.totalorder %s2928_s25, %s2929_s27 }
 0x8b8   : > { %p2931_p12 = pnand %p2930_p11, %p3148_p5 }
 0x8ba   : > { %p2932_p13 = pneg %p2931_p12 }
 0x904   : > { %v3697_v55 = vpop.f32.mrf.mxu2 }
 0x905   : > { %v2186_v25 = vadd.f32 %v3697_v55, %v2072_v62 }
 0x907   : > { %v2229_v31 = vpop.xlane.xlu2 %2228 }
 0x908   : > { %v2230_v33 = vsub.f32 %v2224_v29, %v2229_v31 }
 0x90a   : > { %v2231_v57 = vmul.f32 1.442695, %v2230_v33 }
 0x90c   : > { %2900 = vpow2.f32 %v2231_v57 }
 0x90f   : > { %v2239_v34 = vpop.permute.xlu2 %2238 }
 0x910   : > { %2269 = vmatpush.msra.mxu2 %v2239_v34 }
 0x912   : > { %2748 = vmatpush.xpose.msk.msrb.mxu2 %vm816_vm1, %v2310_v7  ;;  %v2901_v35 = vpop.eup %2900 }
 0x913   : > { %v2233_v36 = vsel %vm1663_vm2, %v2901_v35, 0.0 }
 0x914   : > { %2234 = vadd.xlane.f32.xlu0 %v2233_v36 }
 0x916   : > { %2749 = vmatpush.xpose.msk.msrb.mxu2 %vm816_vm1, %v2308_v9 }
 0x928   : > { %2305 = vrot.lane.b32.xlu0 %v3476_v12, %s2983_s1 }
 0x930   : > { %2358 = vrot.lane.b32.xlu0 %v3516_v21, %s2983_s1 }
 0x938   : > { %2423 = vrot.lane.b32.xlu0 %v3491_v52, %s2984_s5 }
 0x940   : > { %2846 = vrot.lane.b32.xlu0 %v3487_v4, %s2983_s1 }
 0x948   : > { %2421 = vrot.lane.b32.xlu0 %v3483_v18, %s2984_s5 }
 0x950   : > { %2352 = vrot.lane.b32.xlu0 %v3528_v22, %s2983_s1  ;;  %s773_s1 = scalar_lea.vmem [#allocation2], %s2645_s6  ;;  %s2933_s6 = scalar_lea.hbm %s3835_s2, 16 }
 0x951   : > { %s2543_s7 = sshll.u32 %s773_s1, 4  ;;  %p2935_p1 = scmp.lt.s32.totalorder %s2933_s6, %s2929_s27  ;;  %s2544_s7 = int_to_ptr.vmem [resolvable:$true] %s2543_s7 }
 0x953   : > { %p2936_p2 = por %p2935_p1, %p2934_p0 }
 0x955   : > { %p2937_p3 = pnand %p2936_p2, %p2932_p13 }
 0x958   : > { %2419 = vrot.lane.b32.xlu0 %v3476_v12, %s2984_s5 }
 0x987   : > { %v2235_v1 = vpop.xlane.xlu0 %2234 }
 0x988   : > { %2902 = vrcp.f32 %v2235_v1 }
 0x98e   : > { %v2903_v37 = vpop.eup %2902 }
 0x98f   : > { %v2237_v41 = vmul.f32 %v2903_v37, %v2901_v35 }
 0x991   : > { %2745 = vmatmul.msk.f32.vlgmr.msra.gmra.mxu2 %vm1663_vm2, %v2237_v41 }
 0x99a   : > { %v2306_v52 = vpop.permute.xlu0 %2305 }
 0x99b   : > { %2750 = vmatpush.xpose.msk.msrb.mxu2 %vm816_vm1, %v2306_v52 }
 0x99f   : > { %2751 = vmatpush.xpose.msk.msrb.mxu2 %vm816_vm1, %v2304_v44 }
 0x9a2   : > { %v2359_v18 = vpop.permute.xlu0 %2358  ;;  %2752 = vmatmul.msk.f32.vlgmr.msrb.gmra.mxu2 %vm816_vm1, %v2302_v46 }
 0x9a3   : > { %2753 = vmatpush.msk.msrb.mxu3 %vm983_vm10, %v2359_v18  ;;  %2764 = vmatpush.msk.msra.mxu2 %vm871_vm0, %v2502_v63 }
 0x9aa   : > { %v2424_v39 = vpop.permute.xlu0 %2423 }
 0x9b2   : > { %v2847_v12 = vpop.permute.xlu0 %2846 }
 0x9b3   : > { %v2848_v47 = vunpack.i.l.bf16 %v2847_v12  ;;  %v2849_v48 = vunpack.i.h.bf16 %v2847_v12 }
 0x9b5   : > { %2381 = vmatpush.msrb.mxu3 %v2848_v47 }
 0x9b7   : > { %2382 = vmatpush.msrb.mxu3 %v2849_v48 }
 0x9ba   : > { %v2422_v50 = vpop.permute.xlu0 %2421 }
 0x9c2   : > { %v2353_v53 = vpop.permute.xlu0 %2352 }
 0x9c3   : > { %2383 = vmatpush.msrb.mxu3 %v2353_v53 }
 0x9ca   : > { %v2420_v56 = vpop.permute.xlu0 %2419 }
 0xa14   : > { %v2271_v42 = vpop.f32.mrf.mxu2 }
 0xa15   : > { %2747 = vmatmul.msk.f32.vlgmr.msra.gmra.mxu3 %vm816_vm1, %v2271_v42 }
 0xa16   : > { %2757 = vmatpush.xpose.msk.msra.mxu3 %vm816_vm1, %v2424_v39 }
 0xa1a   : > { %2758 = vmatpush.xpose.msk.msra.mxu3 %vm816_vm1, %v2422_v50 }
 0xa1e   : > { %2759 = vmatpush.xpose.msk.msra.mxu3 %vm816_vm1, %v2420_v56 }
 0xa25   : > { %v2338_v59 = vpop.f32.mrf.mxu2 }
 0xa26   : > { %v2341_v38 = vsel %vm1663_vm2, %v2338_v59, -inf }
 0xa27   : > { %2342 = vmax.xlane.f32.xlu1 %v2341_v38 }
 0xa40   : > { %2417 = vrot.lane.b32.xlu1 %v3489_v19, %s2984_s5 }
 0xa48   : > { %2472 = vrot.lane.b32.xlu1 %v3516_v21, %s2984_s5 }
 0xa50   : > { %2851 = vrot.lane.b32.xlu1 %v3487_v4, %s2984_s5 }
 0xa58   : > { %2466 = vrot.lane.b32.xlu1 %v3528_v22, %s2984_s5 }
 0xa98   : > { %v2297_v13 = vpop.f32.mrf.mxu3 }
 0xa99   : > { %v2300_v29 = vadd.f32 %v2297_v13, %v2186_v25 }
 0xa9a   : > { %v2343_v58 = vpop.xlane.xlu1 %2342 }
 0xa9b   : > { %v2344_v19 = vsub.f32 %v2338_v59, %v2343_v58 }
 0xa9d   : > { %v2345_v0 = vmul.f32 1.442695, %v2344_v19 }
 0xa9f   : > { %2904 = vpow2.f32 %v2345_v0 }
 0xaa5   : > { %v2905_v21 = vpop.eup %2904 }
 0xaa6   : > { %v2347_v51 = vsel %vm1663_vm2, %v2905_v21, 0.0 }
 0xaa7   : > { %2348 = vadd.xlane.f32.xlu2 %v2347_v51 }
 0xab2   : > { %v2418_v4 = vpop.permute.xlu1 %2417 }
 0xab3   : > { %2760 = vmatpush.xpose.msk.msra.mxu3 %vm816_vm1, %v2418_v4 }
 0xaba   : > { %v2473_v22 = vpop.permute.xlu1 %2472 }
 0xabb   : > { %2762 = vmatpush.msk.msra.mxu1 %vm983_vm10, %v2473_v22 }
 0xabf   : > { %2415 = vrot.lane.b32.xlu2 %v3506_v54, %s2984_s5  ;;  %s2531_s5 = scalar_lea.sflag [#allocation3], %s771_s28 }
 0xac2   : > { %v2852_v3 = vpop.permute.xlu1 %2851 }
 0xac3   : > { %v2853_v5 = vunpack.i.l.bf16 %v2852_v3  ;;  %v2854_v6 = vunpack.i.h.bf16 %v2852_v3 }
 0xac5   : > { %2495 = vmatpush.msra.mxu1 %v2853_v5 }
 0xac7   : > { %2496 = vmatpush.msra.mxu1 %v2854_v6 }
 0xaca   : > { %v2467_v8 = vpop.permute.xlu1 %2466 }
 0xacb   : > { %2497 = vmatpush.msra.mxu1 %v2467_v8 }
 0xb1a   : > { %v2349_v10 = vpop.xlane.xlu2 %2348 }
 0xb1b   : > { %2906 = vrcp.f32 %v2349_v10 }
 0xb21   : > { %v2907_v11 = vpop.eup %2906 }
 0xb22   : > { %v2351_v45 = vmul.f32 %v2907_v11, %v2905_v21  ;;  %v2416_v14 = vpop.permute.xlu2 %2415 }
 0xb24   : > { %2754 = vmatmul.msk.f32.vlgmr.msrb.gmra.mxu3 %vm1663_vm2, %v2351_v45 }
 0xb2c   : > { %2761 = vmatmul.msk.f32.vlgmr.msra.gmra.mxu3 %vm816_vm1, %v2416_v14 }
 0xba7   : > { %v2385_v15 = vpop.f32.mrf.mxu3 }
 0xba8   : > { %2756 = vmatmul.msk.f32.vlgmr.msrb.gmra.mxu1 %vm816_vm1, %v2385_v15 }
 0xbaf   : > { %v2452_v54 = vpop.f32.mrf.mxu3 }
 0xbb0   : > { %v2455_v16 = vsel %vm1663_vm2, %v2452_v54, -inf }
 0xbb1   : > { %2456 = vmax.xlane.f32.xlu0 %v2455_v16 }
 0xc24   : > { %v2457_v32 = vpop.xlane.xlu0 %2456 }
 0xc25   : > { %v2458_v43 = vsub.f32 %v2452_v54, %v2457_v32  ;;  %v2411_v7 = vpop.f32.mrf.mxu1 }
 0xc26   : > { %v2414_v30 = vadd.f32 %v2411_v7, %v2300_v29 }
 0xc27   : > { %v2459_v17 = vmul.f32 1.442695, %v2458_v43 }
 0xc29   : > { %2908 = vpow2.f32 %v2459_v17 }
 0xc2f   : > { %v2909_v20 = vpop.eup %2908 }
 0xc30   : > { %v2461_v49 = vsel %vm1663_vm2, %v2909_v20, 0.0 }
 0xc31   : > { %2462 = vadd.xlane.f32.xlu2 %v2461_v49 }
 0xca4   : > { %v2463_v40 = vpop.xlane.xlu2 %2462 }
 0xca5   : > { %2910 = vrcp.f32 %v2463_v40 }
 0xcab   : > { %v2911_v23 = vpop.eup %2910 }
 0xcac   : > { %v2465_v24 = vmul.f32 %v2911_v23, %v2909_v20 }
 0xcae   : > { %2763 = vmatmul.msk.f32.vlgmr.msra.gmra.mxu1 %vm1663_vm2, %v2465_v24 }
 0xd2b   : > { %v2499_v26 = vpop.f32.mrf.mxu1 }
 0xd2c   : > { %2765 = vmatmul.msk.f32.vlgmr.msra.gmra.mxu2 %vm816_vm1, %v2499_v26 }
 0xdaf   : > { %v2525_v31 = vpop.f32.mrf.mxu2 }
 0xdb0   : > { %v2528_v33 = vadd.f32 %v2525_v31, %v2414_v30 }
 0xdb2   : > { %2529 = vst.msk [vmem:[%s773_s1] sm:$0xff] %vm1330_vm4, %v2528_v33 }
 0xdb3   : > { %2940 = shalt.err (!%p2937_p3)
}
 0xdb4   : > { %2773 = dma.vmem_to_hbm [thread:$0]  (%p3148_p5), %s2544_s7, 128, %s2546_s29, %s2531_s5  }
 0xdb5 PF: > { %s3837_s28 = sld [smem:[#allocation7_spill]] }
 0xdb6   : > { %s3838_s30 = sld [smem:[#allocation5_spill]] }
 0xdbb   : > { %p2779_p4 = scmp.ge.s32.totalorder %s3837_s28, 2 }
 0xdbc   : > { %s2557_s9 = sand.u32 1, %s3838_s30  }
 0xdbd   : > { %p2776_p7 = pnand %p2779_p4, %p3152_p6  ;;  %s2558_s24 = scalar_lea.sflag [#allocation3], %s2557_s9 }
 0xdbf   : > { %p2777_p8 = pneg %p2776_p7 }
 0xdc1   : > { %2958 = dma.done.wait (%p2777_p8), %s2558_s24, 128  }
 0xdc2   : > { %2960 = vsyncadd (%p2777_p8), %s2558_s24, 4294967168  ;;  %s3840_s28 = sld [smem:[#allocation9_spill]]  ;;  %s3843_s5 = smov %s2967_s26 }
 0xdc3   : > { %s3841_s25 = sld [smem:[#allocation6_spill]] }
 0xdc4   : > { %s3842_s27 = sld [smem:[#allocation10_spill]] }
 0xdc8   : > { %p34_p9 = scmp.ge.s32.totalorder %s3840_s28, 4  }
 0xdc9   : > { %s3844_s26 = smov %s3841_s25 }
 0xdca   :  { %36 = sbr.rel (!%p34_p9) target bundleno = 15 (0xf), region = 160 }
 0xdcf   :  { %2564 = vsyncpa [#allocation3], 1 }
 0xdd0   :  { %2566 = vsyncpa [#allocation3 + $0x1], 1 }

</bundles_post_ra>
